<compile_context>
chip_gen: v7x
topology: tpu7x:2x2x1
jax: 0.10.0
libtpu: 0.0.40
codegen_flags: <defaults>
</compile_context>

<pallas_src>
import functools
import math

import jax
import jax.numpy as jnp
import numpy as np
from jax.experimental import pallas as pl
from jax.experimental.pallas import tpu as pltpu


def _mha_kernel(xq_ref, xk_ref, xv_ref,
                w_in_ref, b_in_ref, w_out_ref, b_out_ref,
                o_ref, *, nheads, d_k, block_b, seq_t, compute_dtype):
    # xq/xk/xv refs: (block_b, T, D)
    # w_in_ref:  (3*H, D, d_k)  -- [Wq heads | Wk heads | Wv heads], bf16
    # b_in_ref:  (3*H, 1, d_k)  -- matching biases, f32
    # w_out_ref: (H, d_k, D)    -- output projection split per head, bf16
    # b_out_ref: (1, D)         -- output bias, f32
    f32 = jnp.float32
    d_model = nheads * d_k
    m = block_b * seq_t

    # Flatten the slab/time axes into one big MXU M-dimension (layout-free
    # reshape: last dim unchanged, T==sublane tile).
    xq = xq_ref[...].reshape(m, d_model).astype(compute_dtype)
    xk = xk_ref[...].reshape(m, d_model).astype(compute_dtype)
    xv = xv_ref[...].reshape(m, d_model).astype(compute_dtype)

    scale = 1.0 / math.sqrt(d_k)
    acc = jnp.zeros((m, d_model), f32)

    for h in range(nheads):  # static unroll; only leading-dim weight indexing
        wq_h = w_in_ref[h]
        wk_h = w_in_ref[nheads + h]
        wv_h = w_in_ref[2 * nheads + h]

        qh = jnp.dot(xq, wq_h, preferred_element_type=f32) + b_in_ref[h]
        kh = jnp.dot(xk, wk_h, preferred_element_type=f32) + b_in_ref[nheads + h]
        vh = jnp.dot(xv, wv_h, preferred_element_type=f32) + b_in_ref[2 * nheads + h]

        # (m, d_k) -> (block_b, T, d_k): free (groups of T rows == tile rows).
        qh = qh.reshape(block_b, seq_t, d_k).astype(compute_dtype)
        kh = kh.reshape(block_b, seq_t, d_k).astype(compute_dtype)
        vh = vh.reshape(block_b, seq_t, d_k).astype(compute_dtype)

        # Batched scores over the block_b slabs; no explicit transpose needed.
        s = jnp.einsum("bqd,bkd->bqk", qh, kh,
                       preferred_element_type=f32) * scale          # (b, T, T)
        s = s - jnp.max(s, axis=-1, keepdims=True)                   # f32 stats
        p = jnp.exp(s)
        p = p * pl.reciprocal(jnp.sum(p, axis=-1, keepdims=True), approx=True)

        ctx = jnp.einsum("bqk,bkd->bqd", p.astype(compute_dtype), vh,
                         preferred_element_type=f32)                 # (b, T, d_k)

        # Head "concat" + output projection fused: accumulate ctx_h @ Wo_h.
        acc = acc + jnp.dot(ctx.reshape(m, d_k).astype(compute_dtype),
                            w_out_ref[h], preferred_element_type=f32)

    out = acc + b_out_ref[...]
    o_ref[...] = out.reshape(block_b, seq_t, d_model).astype(o_ref.dtype)


def _resident_spec(shape):
    """Whole-array block, constant index -> fetched once, stays VMEM-resident."""
    n = len(shape)
    return pl.BlockSpec(shape, lambda i, _n=n: (0,) * _n)


def multi_headed_attention(q, k, v, params, *, nheads, block_b=32,
                           compute_dtype=jnp.bfloat16):
    """q, k, v: (N, S, T, D). params: PyTorch-convention weights (W: (out,in))."""
    N, S, T, D = q.shape
    assert D % nheads == 0
    d_k = D // nheads
    B = N * S

    # Pick the slab-block size: as large as reasonable, but keep >= 2 grid
    # steps when possible so the parallel grid axis can use both TCs (v7x).
    block_b = max(1, min(block_b, B))
    if B >= 2 and B // block_b < 2:
        block_b = max(1, B // 2)
    grid_b = pl.cdiv(B, block_b)
    B_pad = grid_b * block_b

    qf = q.reshape(B, T, D)
    kf = k.reshape(B, T, D)
    vf = v.reshape(B, T, D)
    if B_pad != B:
        pad = ((0, B_pad - B), (0, 0), (0, 0))
        qf = jnp.pad(qf, pad)
        kf = jnp.pad(kf, pad)
        vf = jnp.pad(vf, pad)

    # --- host-side weight prep ---------------------------------------------
    # PyTorch nn.Linear: y = x @ W.T + b with W of shape (out, in).
    # Split the projection weights per head so the kernel never slices the
    # lane dimension:  W.T -> (H, D, d_k); output proj Wo.T -> (H, d_k, D).
    def per_head_in(w, b):
        wt = jnp.asarray(w).T.reshape(D, nheads, d_k).transpose(1, 0, 2)  # (H, D, d_k)
        bh = jnp.asarray(b).reshape(nheads, 1, d_k)                        # (H, 1, d_k)
        return wt, bh

    wq_h, bq_h = per_head_in(params["wq"], params["bq"])
    wk_h, bk_h = per_head_in(params["wk"], params["bk"])
    wv_h, bv_h = per_head_in(params["wv"], params["bv"])

    w_in = jnp.concatenate([wq_h, wk_h, wv_h], axis=0).astype(compute_dtype)  # (3H, D, d_k)
    b_in = jnp.concatenate([bq_h, bk_h, bv_h], axis=0).astype(jnp.float32)    # (3H, 1, d_k)
    w_out = jnp.asarray(params["wo"]).T.reshape(nheads, d_k, D).astype(compute_dtype)  # (H, d_k, D)
    b_out = jnp.asarray(params["bo"]).reshape(1, D).astype(jnp.float32)       # (1, D)

    x_spec = pl.BlockSpec((block_b, T, D), lambda i: (i, 0, 0))

    out = pl.pallas_call(
        functools.partial(_mha_kernel, nheads=nheads, d_k=d_k, block_b=block_b,
                          seq_t=T, compute_dtype=compute_dtype),
        out_shape=jax.ShapeDtypeStruct((B_pad, T, D), q.dtype),
        grid=(grid_b,),
        in_specs=[x_spec, x_spec, x_spec,
                  _resident_spec(w_in.shape), _resident_spec(b_in.shape),
                  _resident_spec(w_out.shape), _resident_spec(b_out.shape)],
        out_specs=pl.BlockSpec((block_b, T, D), lambda i: (i, 0, 0)),
        compiler_params=pltpu.CompilerParams(
            dimension_semantics=("parallel",),
            vmem_limit_bytes=32 * 1024 * 1024),
    )(qf, kf, vf, w_in, b_in, w_out, b_out)

    return out[:B].reshape(N, S, T, D)


def _reference(q, k, v, params, *, nheads):
    """Pure-JAX f32 reference mirroring the PyTorch forward (eval, mask=None)."""
    N, S, T, D = q.shape
    d_k = D // nheads

    def lin(x, w, b):
        return jnp.einsum("nstd,ed->nste", x, w) + b   # x @ W.T + b

    def split_heads(x):  # (N,S,T,D) -> (N,H,S,T,d_k)
        return x.reshape(N, S, T, nheads, d_k).transpose(0, 3, 1, 2, 4)

    Q = split_heads(lin(q, params["wq"], params["bq"]))
    K = split_heads(lin(k, params["wk"], params["bk"]))
    V = split_heads(lin(v, params["wv"], params["bv"]))

    scores = jnp.einsum("nhstd,nhsud->nhstu", Q, K) / math.sqrt(d_k)
    p = jax.nn.softmax(scores, axis=-1)
    x = jnp.einsum("nhstu,nhsud->nhstd", p, V)
    x = x.transpose(0, 2, 3, 1, 4).reshape(N, S, T, D)
    return jnp.einsum("nstd,ed->nste", x, params["wo"]) + params["bo"]


if __name__ == "__main__":
    # Small shapes consistent with the module's (N, S, T, D) convention.
    N, S, T, D = 2, 4, 8, 32
    nheads = 4

    key = jax.random.PRNGKey(0)
    ks = jax.random.split(key, 11)

    q = jax.random.normal(ks[0], (N, S, T, D), dtype=jnp.float32)
    k = jax.random.normal(ks[1], (N, S, T, D), dtype=jnp.float32)
    v = jax.random.normal(ks[2], (N, S, T, D), dtype=jnp.float32)

    bound = 1.0 / math.sqrt(D)  # nn.Linear default init range
    params = {
        "wq": jax.random.uniform(ks[3], (D, D), jnp.float32, -bound, bound),
        "bq": jax.random.uniform(ks[4], (D,), jnp.float32, -bound, bound),
        "wk": jax.random.uniform(ks[5], (D, D), jnp.float32, -bound, bound),
        "bk": jax.random.uniform(ks[6], (D,), jnp.float32, -bound, bound),
        "wv": jax.random.uniform(ks[7], (D, D), jnp.float32, -bound, bound),
        "bv": jax.random.uniform(ks[8], (D,), jnp.float32, -bound, bound),
        "wo": jax.random.uniform(ks[9], (D, D), jnp.float32, -bound, bound),
        "bo": jax.random.uniform(ks[10], (D,), jnp.float32, -bound, bound),
    }

    out = multi_headed_attention(q, k, v, params, nheads=nheads)
    out = jax.block_until_ready(out)

    ref = _reference(q, k, v, params, nheads=nheads)
    # bf16 matmul operands (f32 accumulation) -> relaxed tolerance vs f32 ref.
    np.testing.assert_allclose(np.asarray(out), np.asarray(ref), rtol=2e-2, atol=2e-2)

    print("KERNEL_OK")
</pallas_src>

<mosaic_0001>
module attributes {stable_mosaic.version = 11 : i64} {
  func.func @_mha_kernel(%arg0: i32, %arg1: memref<4x8x32xf32, #tpu.memory_space<vmem>>, %arg2: memref<4x8x32xf32, #tpu.memory_space<vmem>>, %arg3: memref<4x8x32xf32, #tpu.memory_space<vmem>>, %arg4: memref<12x32x8xbf16, #tpu.memory_space<vmem>>, %arg5: memref<12x1x8xf32, #tpu.memory_space<vmem>>, %arg6: memref<4x8x32xbf16, #tpu.memory_space<vmem>>, %arg7: memref<1x32xf32, #tpu.memory_space<vmem>>, %arg8: memref<4x8x32xf32, #tpu.memory_space<vmem>>) attributes {dimension_semantics = [#tpu.dimension_semantics<parallel>], iteration_bounds = array<i64: 2>, scalar_prefetch = 0 : i64, scratch_operands = 0 : i64, tpu.core_type = #tpu.core_type<tc>, window_params = [{transform_indices = @transform_0, window_bounds = array<i64: 4, 8, 32>}, {transform_indices = @transform_1, window_bounds = array<i64: 4, 8, 32>}, {transform_indices = @transform_2, window_bounds = array<i64: 4, 8, 32>}, {pipeline_mode = #tpu.pipeline_mode<synchronous>, transform_indices = @transform_3, window_bounds = array<i64: 12, 32, 8>}, {pipeline_mode = #tpu.pipeline_mode<synchronous>, transform_indices = @transform_4, window_bounds = array<i64: 12, 1, 8>}, {pipeline_mode = #tpu.pipeline_mode<synchronous>, transform_indices = @transform_5, window_bounds = array<i64: 4, 8, 32>}, {pipeline_mode = #tpu.pipeline_mode<synchronous>, transform_indices = @transform_6, window_bounds = array<i64: 1, 32>}, {transform_indices = @transform_7, window_bounds = array<i64: 4, 8, 32>}]} {
    %c0 = arith.constant 0 : index
    %c0_0 = arith.constant 0 : index
    %c0_1 = arith.constant 0 : index
    %0 = vector.load %arg1[%c0, %c0_0, %c0_1] : memref<4x8x32xf32, #tpu.memory_space<vmem>>, vector<4x8x32xf32>
    %1 = vector.shape_cast %0 : vector<4x8x32xf32> to vector<32x32xf32>
    %2 = arith.truncf %1 : vector<32x32xf32> to vector<32x32xbf16>
    %c0_2 = arith.constant 0 : index
    %c0_3 = arith.constant 0 : index
    %c0_4 = arith.constant 0 : index
    %3 = vector.load %arg2[%c0_2, %c0_3, %c0_4] : memref<4x8x32xf32, #tpu.memory_space<vmem>>, vector<4x8x32xf32>
    %4 = vector.shape_cast %3 : vector<4x8x32xf32> to vector<32x32xf32>
    %5 = arith.truncf %4 : vector<32x32xf32> to vector<32x32xbf16>
    %c0_5 = arith.constant 0 : index
    %c0_6 = arith.constant 0 : index
    %c0_7 = arith.constant 0 : index
    %6 = vector.load %arg3[%c0_5, %c0_6, %c0_7] : memref<4x8x32xf32, #tpu.memory_space<vmem>>, vector<4x8x32xf32>
    %7 = vector.shape_cast %6 : vector<4x8x32xf32> to vector<32x32xf32>
    %8 = arith.truncf %7 : vector<32x32xf32> to vector<32x32xbf16>
    %cst = arith.constant 0.000000e+00 : f32
    %9 = vector.broadcast %cst : f32 to vector<32x32xf32>
    %c0_8 = arith.constant 0 : index
    %c0_9 = arith.constant 0 : index
    %c0_10 = arith.constant 0 : index
    %10 = vector.load %arg4[%c0_8, %c0_9, %c0_10] : memref<12x32x8xbf16, #tpu.memory_space<vmem>>, vector<1x32x8xbf16>
    %11 = vector.shape_cast %10 : vector<1x32x8xbf16> to vector<32x8xbf16>
    %c4 = arith.constant 4 : index
    %c0_11 = arith.constant 0 : index
    %c0_12 = arith.constant 0 : index
    %12 = vector.load %arg4[%c4, %c0_11, %c0_12] : memref<12x32x8xbf16, #tpu.memory_space<vmem>>, vector<1x32x8xbf16>
    %13 = vector.shape_cast %12 : vector<1x32x8xbf16> to vector<32x8xbf16>
    %c8 = arith.constant 8 : index
    %c0_13 = arith.constant 0 : index
    %c0_14 = arith.constant 0 : index
    %14 = vector.load %arg4[%c8, %c0_13, %c0_14] : memref<12x32x8xbf16, #tpu.memory_space<vmem>>, vector<1x32x8xbf16>
    %15 = vector.shape_cast %14 : vector<1x32x8xbf16> to vector<32x8xbf16>
    %cst_15 = arith.constant dense<0.000000e+00> : vector<32x8xf32>
    %16 = tpu.matmul %2, %11, %cst_15 {dimension_numbers = #tpu.dot_dimension_numbers<[1], [0], [0], [1], [0, 0, 1, 1], [], []>} : vector<32x32xbf16>, vector<32x8xbf16>, vector<32x8xf32> -> vector<32x8xf32>
    %c0_16 = arith.constant 0 : index
    %c0_17 = arith.constant 0 : index
    %c0_18 = arith.constant 0 : index
    %17 = vector.load %arg5[%c0_16, %c0_17, %c0_18] : memref<12x1x8xf32, #tpu.memory_space<vmem>>, vector<1x1x8xf32>
    %18 = vector.shape_cast %17 : vector<1x1x8xf32> to vector<1x8xf32>
    %19 = vector.broadcast %18 : vector<1x8xf32> to vector<32x8xf32>
    %20 = arith.addf %16, %19 : vector<32x8xf32>
    %cst_19 = arith.constant dense<0.000000e+00> : vector<32x8xf32>
    %21 = tpu.matmul %5, %13, %cst_19 {dimension_numbers = #tpu.dot_dimension_numbers<[1], [0], [0], [1], [0, 0, 1, 1], [], []>} : vector<32x32xbf16>, vector<32x8xbf16>, vector<32x8xf32> -> vector<32x8xf32>
    %c4_20 = arith.constant 4 : index
    %c0_21 = arith.constant 0 : index
    %c0_22 = arith.constant 0 : index
    %22 = vector.load %arg5[%c4_20, %c0_21, %c0_22] : memref<12x1x8xf32, #tpu.memory_space<vmem>>, vector<1x1x8xf32>
    %23 = vector.shape_cast %22 : vector<1x1x8xf32> to vector<1x8xf32>
    %24 = vector.broadcast %23 : vector<1x8xf32> to vector<32x8xf32>
    %25 = arith.addf %21, %24 : vector<32x8xf32>
    %cst_23 = arith.constant dense<0.000000e+00> : vector<32x8xf32>
    %26 = tpu.matmul %8, %15, %cst_23 {dimension_numbers = #tpu.dot_dimension_numbers<[1], [0], [0], [1], [0, 0, 1, 1], [], []>} : vector<32x32xbf16>, vector<32x8xbf16>, vector<32x8xf32> -> vector<32x8xf32>
    %c8_24 = arith.constant 8 : index
    %c0_25 = arith.constant 0 : index
    %c0_26 = arith.constant 0 : index
    %27 = vector.load %arg5[%c8_24, %c0_25, %c0_26] : memref<12x1x8xf32, #tpu.memory_space<vmem>>, vector<1x1x8xf32>
    %28 = vector.shape_cast %27 : vector<1x1x8xf32> to vector<1x8xf32>
    %29 = vector.broadcast %28 : vector<1x8xf32> to vector<32x8xf32>
    %30 = arith.addf %26, %29 : vector<32x8xf32>
    %31 = vector.shape_cast %20 : vector<32x8xf32> to vector<4x8x8xf32>
    %32 = arith.truncf %31 : vector<4x8x8xf32> to vector<4x8x8xbf16>
    %33 = vector.shape_cast %25 : vector<32x8xf32> to vector<4x8x8xf32>
    %34 = arith.truncf %33 : vector<4x8x8xf32> to vector<4x8x8xbf16>
    %35 = vector.shape_cast %30 : vector<32x8xf32> to vector<4x8x8xf32>
    %36 = arith.truncf %35 : vector<4x8x8xf32> to vector<4x8x8xbf16>
    "tpu.trace_start"() <{level = 10 : i32, message = "bqd,bkd->bqk"}> : () -> ()
    %cst_27 = arith.constant dense<0.000000e+00> : vector<4x8x8xf32>
    %37 = tpu.matmul %32, %34, %cst_27 {dimension_numbers = #tpu.dot_dimension_numbers<[2], [2], [1], [1], [0, 0, 0, 1, 1, 1], [0], [0]>} : vector<4x8x8xbf16>, vector<4x8x8xbf16>, vector<4x8x8xf32> -> vector<4x8x8xf32>
    "tpu.trace_stop"() : () -> ()
    %cst_28 = arith.constant 0.353553385 : f32
    %38 = vector.broadcast %cst_28 : f32 to vector<4x8x8xf32>
    %39 = arith.mulf %37, %38 : vector<4x8x8xf32>
    %cst_29 = arith.constant dense<0xFF800000> : vector<4x8xf32>
    %40 = vector.multi_reduction <maximumf>, %39, %cst_29 [2] : vector<4x8x8xf32> to vector<4x8xf32>
    %41 = vector.shape_cast %40 : vector<4x8xf32> to vector<4x8x1xf32>
    %42 = vector.broadcast %41 : vector<4x8x1xf32> to vector<4x8x8xf32>
    %43 = arith.subf %39, %42 : vector<4x8x8xf32>
    %44 = math.exp %43 : vector<4x8x8xf32>
    %cst_30 = arith.constant dense<0.000000e+00> : vector<4x8xf32>
    %45 = vector.multi_reduction <add>, %44, %cst_30 [2] : vector<4x8x8xf32> to vector<4x8xf32>
    %46 = vector.shape_cast %45 : vector<4x8xf32> to vector<4x8x1xf32>
    %47 = tpu.reciprocal %46 {approx = true} : vector<4x8x1xf32> -> vector<4x8x1xf32>
    %48 = vector.broadcast %47 : vector<4x8x1xf32> to vector<4x8x8xf32>
    %49 = arith.mulf %44, %48 : vector<4x8x8xf32>
    %50 = arith.truncf %49 : vector<4x8x8xf32> to vector<4x8x8xbf16>
    "tpu.trace_start"() <{level = 10 : i32, message = "bqk,bkd->bqd"}> : () -> ()
    %cst_31 = arith.constant dense<0.000000e+00> : vector<4x8x8xf32>
    %51 = tpu.matmul %50, %36, %cst_31 {dimension_numbers = #tpu.dot_dimension_numbers<[2], [1], [1], [2], [0, 0, 0, 1, 1, 2], [0], [0]>} : vector<4x8x8xbf16>, vector<4x8x8xbf16>, vector<4x8x8xf32> -> vector<4x8x8xf32>
    "tpu.trace_stop"() : () -> ()
    %52 = vector.shape_cast %51 : vector<4x8x8xf32> to vector<32x8xf32>
    %53 = arith.truncf %52 : vector<32x8xf32> to vector<32x8xbf16>
    %c0_32 = arith.constant 0 : index
    %c0_33 = arith.constant 0 : index
    %c0_34 = arith.constant 0 : index
    %54 = vector.load %arg6[%c0_32, %c0_33, %c0_34] : memref<4x8x32xbf16, #tpu.memory_space<vmem>>, vector<1x8x32xbf16>
    %55 = vector.shape_cast %54 : vector<1x8x32xbf16> to vector<8x32xbf16>
    %cst_35 = arith.constant dense<0.000000e+00> : vector<32x32xf32>
    %56 = tpu.matmul %53, %55, %cst_35 {dimension_numbers = #tpu.dot_dimension_numbers<[1], [0], [0], [1], [0, 0, 1, 1], [], []>} : vector<32x8xbf16>, vector<8x32xbf16>, vector<32x32xf32> -> vector<32x32xf32>
    %57 = arith.addf %9, %56 : vector<32x32xf32>
    %c1 = arith.constant 1 : index
    %c0_36 = arith.constant 0 : index
    %c0_37 = arith.constant 0 : index
    %58 = vector.load %arg4[%c1, %c0_36, %c0_37] : memref<12x32x8xbf16, #tpu.memory_space<vmem>>, vector<1x32x8xbf16>
    %59 = vector.shape_cast %58 : vector<1x32x8xbf16> to vector<32x8xbf16>
    %c5 = arith.constant 5 : index
    %c0_38 = arith.constant 0 : index
    %c0_39 = arith.constant 0 : index
    %60 = vector.load %arg4[%c5, %c0_38, %c0_39] : memref<12x32x8xbf16, #tpu.memory_space<vmem>>, vector<1x32x8xbf16>
    %61 = vector.shape_cast %60 : vector<1x32x8xbf16> to vector<32x8xbf16>
    %c9 = arith.constant 9 : index
    %c0_40 = arith.constant 0 : index
    %c0_41 = arith.constant 0 : index
    %62 = vector.load %arg4[%c9, %c0_40, %c0_41] : memref<12x32x8xbf16, #tpu.memory_space<vmem>>, vector<1x32x8xbf16>
    %63 = vector.shape_cast %62 : vector<1x32x8xbf16> to vector<32x8xbf16>
    %cst_42 = arith.constant dense<0.000000e+00> : vector<32x8xf32>
    %64 = tpu.matmul %2, %59, %cst_42 {dimension_numbers = #tpu.dot_dimension_numbers<[1], [0], [0], [1], [0, 0, 1, 1], [], []>} : vector<32x32xbf16>, vector<32x8xbf16>, vector<32x8xf32> -> vector<32x8xf32>
    %c1_43 = arith.constant 1 : index
    %c0_44 = arith.constant 0 : index
    %c0_45 = arith.constant 0 : index
    %65 = vector.load %arg5[%c1_43, %c0_44, %c0_45] : memref<12x1x8xf32, #tpu.memory_space<vmem>>, vector<1x1x8xf32>
    %66 = vector.shape_cast %65 : vector<1x1x8xf32> to vector<1x8xf32>
    %67 = vector.broadcast %66 : vector<1x8xf32> to vector<32x8xf32>
    %68 = arith.addf %64, %67 : vector<32x8xf32>
    %cst_46 = arith.constant dense<0.000000e+00> : vector<32x8xf32>
    %69 = tpu.matmul %5, %61, %cst_46 {dimension_numbers = #tpu.dot_dimension_numbers<[1], [0], [0], [1], [0, 0, 1, 1], [], []>} : vector<32x32xbf16>, vector<32x8xbf16>, vector<32x8xf32> -> vector<32x8xf32>
    %c5_47 = arith.constant 5 : index
    %c0_48 = arith.constant 0 : index
    %c0_49 = arith.constant 0 : index
    %70 = vector.load %arg5[%c5_47, %c0_48, %c0_49] : memref<12x1x8xf32, #tpu.memory_space<vmem>>, vector<1x1x8xf32>
    %71 = vector.shape_cast %70 : vector<1x1x8xf32> to vector<1x8xf32>
    %72 = vector.broadcast %71 : vector<1x8xf32> to vector<32x8xf32>
    %73 = arith.addf %69, %72 : vector<32x8xf32>
    %cst_50 = arith.constant dense<0.000000e+00> : vector<32x8xf32>
    %74 = tpu.matmul %8, %63, %cst_50 {dimension_numbers = #tpu.dot_dimension_numbers<[1], [0], [0], [1], [0, 0, 1, 1], [], []>} : vector<32x32xbf16>, vector<32x8xbf16>, vector<32x8xf32> -> vector<32x8xf32>
    %c9_51 = arith.constant 9 : index
    %c0_52 = arith.constant 0 : index
    %c0_53 = arith.constant 0 : index
    %75 = vector.load %arg5[%c9_51, %c0_52, %c0_53] : memref<12x1x8xf32, #tpu.memory_space<vmem>>, vector<1x1x8xf32>
    %76 = vector.shape_cast %75 : vector<1x1x8xf32> to vector<1x8xf32>
    %77 = vector.broadcast %76 : vector<1x8xf32> to vector<32x8xf32>
    %78 = arith.addf %74, %77 : vector<32x8xf32>
    %79 = vector.shape_cast %68 : vector<32x8xf32> to vector<4x8x8xf32>
    %80 = arith.truncf %79 : vector<4x8x8xf32> to vector<4x8x8xbf16>
    %81 = vector.shape_cast %73 : vector<32x8xf32> to vector<4x8x8xf32>
    %82 = arith.truncf %81 : vector<4x8x8xf32> to vector<4x8x8xbf16>
    %83 = vector.shape_cast %78 : vector<32x8xf32> to vector<4x8x8xf32>
    %84 = arith.truncf %83 : vector<4x8x8xf32> to vector<4x8x8xbf16>
    "tpu.trace_start"() <{level = 10 : i32, message = "bqd,bkd->bqk"}> : () -> ()
    %cst_54 = arith.constant dense<0.000000e+00> : vector<4x8x8xf32>
    %85 = tpu.matmul %80, %82, %cst_54 {dimension_numbers = #tpu.dot_dimension_numbers<[2], [2], [1], [1], [0, 0, 0, 1, 1, 1], [0], [0]>} : vector<4x8x8xbf16>, vector<4x8x8xbf16>, vector<4x8x8xf32> -> vector<4x8x8xf32>
    "tpu.trace_stop"() : () -> ()
    %cst_55 = arith.constant 0.353553385 : f32
    %86 = vector.broadcast %cst_55 : f32 to vector<4x8x8xf32>
    %87 = arith.mulf %85, %86 : vector<4x8x8xf32>
    %cst_56 = arith.constant dense<0xFF800000> : vector<4x8xf32>
    %88 = vector.multi_reduction <maximumf>, %87, %cst_56 [2] : vector<4x8x8xf32> to vector<4x8xf32>
    %89 = vector.shape_cast %88 : vector<4x8xf32> to vector<4x8x1xf32>
    %90 = vector.broadcast %89 : vector<4x8x1xf32> to vector<4x8x8xf32>
    %91 = arith.subf %87, %90 : vector<4x8x8xf32>
    %92 = math.exp %91 : vector<4x8x8xf32>
    %cst_57 = arith.constant dense<0.000000e+00> : vector<4x8xf32>
    %93 = vector.multi_reduction <add>, %92, %cst_57 [2] : vector<4x8x8xf32> to vector<4x8xf32>
    %94 = vector.shape_cast %93 : vector<4x8xf32> to vector<4x8x1xf32>
    %95 = tpu.reciprocal %94 {approx = true} : vector<4x8x1xf32> -> vector<4x8x1xf32>
    %96 = vector.broadcast %95 : vector<4x8x1xf32> to vector<4x8x8xf32>
    %97 = arith.mulf %92, %96 : vector<4x8x8xf32>
    %98 = arith.truncf %97 : vector<4x8x8xf32> to vector<4x8x8xbf16>
    "tpu.trace_start"() <{level = 10 : i32, message = "bqk,bkd->bqd"}> : () -> ()
    %cst_58 = arith.constant dense<0.000000e+00> : vector<4x8x8xf32>
    %99 = tpu.matmul %98, %84, %cst_58 {dimension_numbers = #tpu.dot_dimension_numbers<[2], [1], [1], [2], [0, 0, 0, 1, 1, 2], [0], [0]>} : vector<4x8x8xbf16>, vector<4x8x8xbf16>, vector<4x8x8xf32> -> vector<4x8x8xf32>
    "tpu.trace_stop"() : () -> ()
    %100 = vector.shape_cast %99 : vector<4x8x8xf32> to vector<32x8xf32>
    %101 = arith.truncf %100 : vector<32x8xf32> to vector<32x8xbf16>
    %c1_59 = arith.constant 1 : index
    %c0_60 = arith.constant 0 : index
    %c0_61 = arith.constant 0 : index
    %102 = vector.load %arg6[%c1_59, %c0_60, %c0_61] : memref<4x8x32xbf16, #tpu.memory_space<vmem>>, vector<1x8x32xbf16>
    %103 = vector.shape_cast %102 : vector<1x8x32xbf16> to vector<8x32xbf16>
    %cst_62 = arith.constant dense<0.000000e+00> : vector<32x32xf32>
    %104 = tpu.matmul %101, %103, %cst_62 {dimension_numbers = #tpu.dot_dimension_numbers<[1], [0], [0], [1], [0, 0, 1, 1], [], []>} : vector<32x8xbf16>, vector<8x32xbf16>, vector<32x32xf32> -> vector<32x32xf32>
    %105 = arith.addf %57, %104 : vector<32x32xf32>
    %c2 = arith.constant 2 : index
    %c0_63 = arith.constant 0 : index
    %c0_64 = arith.constant 0 : index
    %106 = vector.load %arg4[%c2, %c0_63, %c0_64] : memref<12x32x8xbf16, #tpu.memory_space<vmem>>, vector<1x32x8xbf16>
    %107 = vector.shape_cast %106 : vector<1x32x8xbf16> to vector<32x8xbf16>
    %c6 = arith.constant 6 : index
    %c0_65 = arith.constant 0 : index
    %c0_66 = arith.constant 0 : index
    %108 = vector.load %arg4[%c6, %c0_65, %c0_66] : memref<12x32x8xbf16, #tpu.memory_space<vmem>>, vector<1x32x8xbf16>
    %109 = vector.shape_cast %108 : vector<1x32x8xbf16> to vector<32x8xbf16>
    %c10 = arith.constant 10 : index
    %c0_67 = arith.constant 0 : index
    %c0_68 = arith.constant 0 : index
    %110 = vector.load %arg4[%c10, %c0_67, %c0_68] : memref<12x32x8xbf16, #tpu.memory_space<vmem>>, vector<1x32x8xbf16>
    %111 = vector.shape_cast %110 : vector<1x32x8xbf16> to vector<32x8xbf16>
    %cst_69 = arith.constant dense<0.000000e+00> : vector<32x8xf32>
    %112 = tpu.matmul %2, %107, %cst_69 {dimension_numbers = #tpu.dot_dimension_numbers<[1], [0], [0], [1], [0, 0, 1, 1], [], []>} : vector<32x32xbf16>, vector<32x8xbf16>, vector<32x8xf32> -> vector<32x8xf32>
    %c2_70 = arith.constant 2 : index
    %c0_71 = arith.constant 0 : index
    %c0_72 = arith.constant 0 : index
    %113 = vector.load %arg5[%c2_70, %c0_71, %c0_72] : memref<12x1x8xf32, #tpu.memory_space<vmem>>, vector<1x1x8xf32>
    %114 = vector.shape_cast %113 : vector<1x1x8xf32> to vector<1x8xf32>
    %115 = vector.broadcast %114 : vector<1x8xf32> to vector<32x8xf32>
    %116 = arith.addf %112, %115 : vector<32x8xf32>
    %cst_73 = arith.constant dense<0.000000e+00> : vector<32x8xf32>
    %117 = tpu.matmul %5, %109, %cst_73 {dimension_numbers = #tpu.dot_dimension_numbers<[1], [0], [0], [1], [0, 0, 1, 1], [], []>} : vector<32x32xbf16>, vector<32x8xbf16>, vector<32x8xf32> -> vector<32x8xf32>
    %c6_74 = arith.constant 6 : index
    %c0_75 = arith.constant 0 : index
    %c0_76 = arith.constant 0 : index
    %118 = vector.load %arg5[%c6_74, %c0_75, %c0_76] : memref<12x1x8xf32, #tpu.memory_space<vmem>>, vector<1x1x8xf32>
    %119 = vector.shape_cast %118 : vector<1x1x8xf32> to vector<1x8xf32>
    %120 = vector.broadcast %119 : vector<1x8xf32> to vector<32x8xf32>
    %121 = arith.addf %117, %120 : vector<32x8xf32>
    %cst_77 = arith.constant dense<0.000000e+00> : vector<32x8xf32>
    %122 = tpu.matmul %8, %111, %cst_77 {dimension_numbers = #tpu.dot_dimension_numbers<[1], [0], [0], [1], [0, 0, 1, 1], [], []>} : vector<32x32xbf16>, vector<32x8xbf16>, vector<32x8xf32> -> vector<32x8xf32>
    %c10_78 = arith.constant 10 : index
    %c0_79 = arith.constant 0 : index
    %c0_80 = arith.constant 0 : index
    %123 = vector.load %arg5[%c10_78, %c0_79, %c0_80] : memref<12x1x8xf32, #tpu.memory_space<vmem>>, vector<1x1x8xf32>
    %124 = vector.shape_cast %123 : vector<1x1x8xf32> to vector<1x8xf32>
    %125 = vector.broadcast %124 : vector<1x8xf32> to vector<32x8xf32>
    %126 = arith.addf %122, %125 : vector<32x8xf32>
    %127 = vector.shape_cast %116 : vector<32x8xf32> to vector<4x8x8xf32>
    %128 = arith.truncf %127 : vector<4x8x8xf32> to vector<4x8x8xbf16>
    %129 = vector.shape_cast %121 : vector<32x8xf32> to vector<4x8x8xf32>
    %130 = arith.truncf %129 : vector<4x8x8xf32> to vector<4x8x8xbf16>
    %131 = vector.shape_cast %126 : vector<32x8xf32> to vector<4x8x8xf32>
    %132 = arith.truncf %131 : vector<4x8x8xf32> to vector<4x8x8xbf16>
    "tpu.trace_start"() <{level = 10 : i32, message = "bqd,bkd->bqk"}> : () -> ()
    %cst_81 = arith.constant dense<0.000000e+00> : vector<4x8x8xf32>
    %133 = tpu.matmul %128, %130, %cst_81 {dimension_numbers = #tpu.dot_dimension_numbers<[2], [2], [1], [1], [0, 0, 0, 1, 1, 1], [0], [0]>} : vector<4x8x8xbf16>, vector<4x8x8xbf16>, vector<4x8x8xf32> -> vector<4x8x8xf32>
    "tpu.trace_stop"() : () -> ()
    %cst_82 = arith.constant 0.353553385 : f32
    %134 = vector.broadcast %cst_82 : f32 to vector<4x8x8xf32>
    %135 = arith.mulf %133, %134 : vector<4x8x8xf32>
    %cst_83 = arith.constant dense<0xFF800000> : vector<4x8xf32>
    %136 = vector.multi_reduction <maximumf>, %135, %cst_83 [2] : vector<4x8x8xf32> to vector<4x8xf32>
    %137 = vector.shape_cast %136 : vector<4x8xf32> to vector<4x8x1xf32>
    %138 = vector.broadcast %137 : vector<4x8x1xf32> to vector<4x8x8xf32>
    %139 = arith.subf %135, %138 : vector<4x8x8xf32>
    %140 = math.exp %139 : vector<4x8x8xf32>
    %cst_84 = arith.constant dense<0.000000e+00> : vector<4x8xf32>
    %141 = vector.multi_reduction <add>, %140, %cst_84 [2] : vector<4x8x8xf32> to vector<4x8xf32>
    %142 = vector.shape_cast %141 : vector<4x8xf32> to vector<4x8x1xf32>
    %143 = tpu.reciprocal %142 {approx = true} : vector<4x8x1xf32> -> vector<4x8x1xf32>
    %144 = vector.broadcast %143 : vector<4x8x1xf32> to vector<4x8x8xf32>
    %145 = arith.mulf %140, %144 : vector<4x8x8xf32>
    %146 = arith.truncf %145 : vector<4x8x8xf32> to vector<4x8x8xbf16>
    "tpu.trace_start"() <{level = 10 : i32, message = "bqk,bkd->bqd"}> : () -> ()
    %cst_85 = arith.constant dense<0.000000e+00> : vector<4x8x8xf32>
    %147 = tpu.matmul %146, %132, %cst_85 {dimension_numbers = #tpu.dot_dimension_numbers<[2], [1], [1], [2], [0, 0, 0, 1, 1, 2], [0], [0]>} : vector<4x8x8xbf16>, vector<4x8x8xbf16>, vector<4x8x8xf32> -> vector<4x8x8xf32>
    "tpu.trace_stop"() : () -> ()
    %148 = vector.shape_cast %147 : vector<4x8x8xf32> to vector<32x8xf32>
    %149 = arith.truncf %148 : vector<32x8xf32> to vector<32x8xbf16>
    %c2_86 = arith.constant 2 : index
    %c0_87 = arith.constant 0 : index
    %c0_88 = arith.constant 0 : index
    %150 = vector.load %arg6[%c2_86, %c0_87, %c0_88] : memref<4x8x32xbf16, #tpu.memory_space<vmem>>, vector<1x8x32xbf16>
    %151 = vector.shape_cast %150 : vector<1x8x32xbf16> to vector<8x32xbf16>
    %cst_89 = arith.constant dense<0.000000e+00> : vector<32x32xf32>
    %152 = tpu.matmul %149, %151, %cst_89 {dimension_numbers = #tpu.dot_dimension_numbers<[1], [0], [0], [1], [0, 0, 1, 1], [], []>} : vector<32x8xbf16>, vector<8x32xbf16>, vector<32x32xf32> -> vector<32x32xf32>
    %153 = arith.addf %105, %152 : vector<32x32xf32>
    %c3 = arith.constant 3 : index
    %c0_90 = arith.constant 0 : index
    %c0_91 = arith.constant 0 : index
    %154 = vector.load %arg4[%c3, %c0_90, %c0_91] : memref<12x32x8xbf16, #tpu.memory_space<vmem>>, vector<1x32x8xbf16>
    %155 = vector.shape_cast %154 : vector<1x32x8xbf16> to vector<32x8xbf16>
    %c7 = arith.constant 7 : index
    %c0_92 = arith.constant 0 : index
    %c0_93 = arith.constant 0 : index
    %156 = vector.load %arg4[%c7, %c0_92, %c0_93] : memref<12x32x8xbf16, #tpu.memory_space<vmem>>, vector<1x32x8xbf16>
    %157 = vector.shape_cast %156 : vector<1x32x8xbf16> to vector<32x8xbf16>
    %c11 = arith.constant 11 : index
    %c0_94 = arith.constant 0 : index
    %c0_95 = arith.constant 0 : index
    %158 = vector.load %arg4[%c11, %c0_94, %c0_95] : memref<12x32x8xbf16, #tpu.memory_space<vmem>>, vector<1x32x8xbf16>
    %159 = vector.shape_cast %158 : vector<1x32x8xbf16> to vector<32x8xbf16>
    %cst_96 = arith.constant dense<0.000000e+00> : vector<32x8xf32>
    %160 = tpu.matmul %2, %155, %cst_96 {dimension_numbers = #tpu.dot_dimension_numbers<[1], [0], [0], [1], [0, 0, 1, 1], [], []>} : vector<32x32xbf16>, vector<32x8xbf16>, vector<32x8xf32> -> vector<32x8xf32>
    %c3_97 = arith.constant 3 : index
    %c0_98 = arith.constant 0 : index
    %c0_99 = arith.constant 0 : index
    %161 = vector.load %arg5[%c3_97, %c0_98, %c0_99] : memref<12x1x8xf32, #tpu.memory_space<vmem>>, vector<1x1x8xf32>
    %162 = vector.shape_cast %161 : vector<1x1x8xf32> to vector<1x8xf32>
    %163 = vector.broadcast %162 : vector<1x8xf32> to vector<32x8xf32>
    %164 = arith.addf %160, %163 : vector<32x8xf32>
    %cst_100 = arith.constant dense<0.000000e+00> : vector<32x8xf32>
    %165 = tpu.matmul %5, %157, %cst_100 {dimension_numbers = #tpu.dot_dimension_numbers<[1], [0], [0], [1], [0, 0, 1, 1], [], []>} : vector<32x32xbf16>, vector<32x8xbf16>, vector<32x8xf32> -> vector<32x8xf32>
    %c7_101 = arith.constant 7 : index
    %c0_102 = arith.constant 0 : index
    %c0_103 = arith.constant 0 : index
    %166 = vector.load %arg5[%c7_101, %c0_102, %c0_103] : memref<12x1x8xf32, #tpu.memory_space<vmem>>, vector<1x1x8xf32>
    %167 = vector.shape_cast %166 : vector<1x1x8xf32> to vector<1x8xf32>
    %168 = vector.broadcast %167 : vector<1x8xf32> to vector<32x8xf32>
    %169 = arith.addf %165, %168 : vector<32x8xf32>
    %cst_104 = arith.constant dense<0.000000e+00> : vector<32x8xf32>
    %170 = tpu.matmul %8, %159, %cst_104 {dimension_numbers = #tpu.dot_dimension_numbers<[1], [0], [0], [1], [0, 0, 1, 1], [], []>} : vector<32x32xbf16>, vector<32x8xbf16>, vector<32x8xf32> -> vector<32x8xf32>
    %c11_105 = arith.constant 11 : index
    %c0_106 = arith.constant 0 : index
    %c0_107 = arith.constant 0 : index
    %171 = vector.load %arg5[%c11_105, %c0_106, %c0_107] : memref<12x1x8xf32, #tpu.memory_space<vmem>>, vector<1x1x8xf32>
    %172 = vector.shape_cast %171 : vector<1x1x8xf32> to vector<1x8xf32>
    %173 = vector.broadcast %172 : vector<1x8xf32> to vector<32x8xf32>
    %174 = arith.addf %170, %173 : vector<32x8xf32>
    %175 = vector.shape_cast %164 : vector<32x8xf32> to vector<4x8x8xf32>
    %176 = arith.truncf %175 : vector<4x8x8xf32> to vector<4x8x8xbf16>
    %177 = vector.shape_cast %169 : vector<32x8xf32> to vector<4x8x8xf32>
    %178 = arith.truncf %177 : vector<4x8x8xf32> to vector<4x8x8xbf16>
    %179 = vector.shape_cast %174 : vector<32x8xf32> to vector<4x8x8xf32>
    %180 = arith.truncf %179 : vector<4x8x8xf32> to vector<4x8x8xbf16>
    "tpu.trace_start"() <{level = 10 : i32, message = "bqd,bkd->bqk"}> : () -> ()
    %cst_108 = arith.constant dense<0.000000e+00> : vector<4x8x8xf32>
    %181 = tpu.matmul %176, %178, %cst_108 {dimension_numbers = #tpu.dot_dimension_numbers<[2], [2], [1], [1], [0, 0, 0, 1, 1, 1], [0], [0]>} : vector<4x8x8xbf16>, vector<4x8x8xbf16>, vector<4x8x8xf32> -> vector<4x8x8xf32>
    "tpu.trace_stop"() : () -> ()
    %cst_109 = arith.constant 0.353553385 : f32
    %182 = vector.broadcast %cst_109 : f32 to vector<4x8x8xf32>
    %183 = arith.mulf %181, %182 : vector<4x8x8xf32>
    %cst_110 = arith.constant dense<0xFF800000> : vector<4x8xf32>
    %184 = vector.multi_reduction <maximumf>, %183, %cst_110 [2] : vector<4x8x8xf32> to vector<4x8xf32>
    %185 = vector.shape_cast %184 : vector<4x8xf32> to vector<4x8x1xf32>
    %186 = vector.broadcast %185 : vector<4x8x1xf32> to vector<4x8x8xf32>
    %187 = arith.subf %183, %186 : vector<4x8x8xf32>
    %188 = math.exp %187 : vector<4x8x8xf32>
    %cst_111 = arith.constant dense<0.000000e+00> : vector<4x8xf32>
    %189 = vector.multi_reduction <add>, %188, %cst_111 [2] : vector<4x8x8xf32> to vector<4x8xf32>
    %190 = vector.shape_cast %189 : vector<4x8xf32> to vector<4x8x1xf32>
    %191 = tpu.reciprocal %190 {approx = true} : vector<4x8x1xf32> -> vector<4x8x1xf32>
    %192 = vector.broadcast %191 : vector<4x8x1xf32> to vector<4x8x8xf32>
    %193 = arith.mulf %188, %192 : vector<4x8x8xf32>
    %194 = arith.truncf %193 : vector<4x8x8xf32> to vector<4x8x8xbf16>
    "tpu.trace_start"() <{level = 10 : i32, message = "bqk,bkd->bqd"}> : () -> ()
    %cst_112 = arith.constant dense<0.000000e+00> : vector<4x8x8xf32>
    %195 = tpu.matmul %194, %180, %cst_112 {dimension_numbers = #tpu.dot_dimension_numbers<[2], [1], [1], [2], [0, 0, 0, 1, 1, 2], [0], [0]>} : vector<4x8x8xbf16>, vector<4x8x8xbf16>, vector<4x8x8xf32> -> vector<4x8x8xf32>
    "tpu.trace_stop"() : () -> ()
    %196 = vector.shape_cast %195 : vector<4x8x8xf32> to vector<32x8xf32>
    %197 = arith.truncf %196 : vector<32x8xf32> to vector<32x8xbf16>
    %c3_113 = arith.constant 3 : index
    %c0_114 = arith.constant 0 : index
    %c0_115 = arith.constant 0 : index
    %198 = vector.load %arg6[%c3_113, %c0_114, %c0_115] : memref<4x8x32xbf16, #tpu.memory_space<vmem>>, vector<1x8x32xbf16>
    %199 = vector.shape_cast %198 : vector<1x8x32xbf16> to vector<8x32xbf16>
    %cst_116 = arith.constant dense<0.000000e+00> : vector<32x32xf32>
    %200 = tpu.matmul %197, %199, %cst_116 {dimension_numbers = #tpu.dot_dimension_numbers<[1], [0], [0], [1], [0, 0, 1, 1], [], []>} : vector<32x8xbf16>, vector<8x32xbf16>, vector<32x32xf32> -> vector<32x32xf32>
    %201 = arith.addf %153, %200 : vector<32x32xf32>
    %c0_117 = arith.constant 0 : index
    %c0_118 = arith.constant 0 : index
    %202 = vector.load %arg7[%c0_117, %c0_118] : memref<1x32xf32, #tpu.memory_space<vmem>>, vector<1x32xf32>
    %203 = vector.broadcast %202 : vector<1x32xf32> to vector<32x32xf32>
    %204 = arith.addf %201, %203 : vector<32x32xf32>
    %205 = vector.shape_cast %204 : vector<32x32xf32> to vector<4x8x32xf32>
    %c0_119 = arith.constant 0 : index
    %c0_120 = arith.constant 0 : index
    %c0_121 = arith.constant 0 : index
    %206 = vector.load %arg8[%c0_119, %c0_120, %c0_121] : memref<4x8x32xf32, #tpu.memory_space<vmem>>, vector<4x8x32xf32>
    tpu.vector_store %arg8[%c0_119, %c0_120, %c0_121], %205 {strides = array<i32>} : memref<4x8x32xf32, #tpu.memory_space<vmem>>, vector<4x8x32xf32>,
    return
  }
  func.func @transform_0(%arg0: i32) -> (i32, i32, i32) {
    %c0_i32 = arith.constant 0 : i32
    %c0_i32_0 = arith.constant 0 : i32
    %c0_i32_1 = arith.constant 0 : i32
    return %arg0, %c0_i32, %c0_i32_0 : i32, i32, i32
  }
  func.func @transform_1(%arg0: i32) -> (i32, i32, i32) {
    %c0_i32 = arith.constant 0 : i32
    %c0_i32_0 = arith.constant 0 : i32
    %c0_i32_1 = arith.constant 0 : i32
    return %arg0, %c0_i32, %c0_i32_0 : i32, i32, i32
  }
  func.func @transform_2(%arg0: i32) -> (i32, i32, i32) {
    %c0_i32 = arith.constant 0 : i32
    %c0_i32_0 = arith.constant 0 : i32
    %c0_i32_1 = arith.constant 0 : i32
    return %arg0, %c0_i32, %c0_i32_0 : i32, i32, i32
  }
  func.func @transform_3(%arg0: i32) -> (i32, i32, i32) {
    %c0_i32 = arith.constant 0 : i32
    %c0_i32_0 = arith.constant 0 : i32
    %c0_i32_1 = arith.constant 0 : i32
    %c0_i32_2 = arith.constant 0 : i32
    return %c0_i32, %c0_i32_0, %c0_i32_1 : i32, i32, i32
  }
  func.func @transform_4(%arg0: i32) -> (i32, i32, i32) {
    %c0_i32 = arith.constant 0 : i32
    %c0_i32_0 = arith.constant 0 : i32
    %c0_i32_1 = arith.constant 0 : i32
    %c0_i32_2 = arith.constant 0 : i32
    return %c0_i32, %c0_i32_0, %c0_i32_1 : i32, i32, i32
  }
  func.func @transform_5(%arg0: i32) -> (i32, i32, i32) {
    %c0_i32 = arith.constant 0 : i32
    %c0_i32_0 = arith.constant 0 : i32
    %c0_i32_1 = arith.constant 0 : i32
    %c0_i32_2 = arith.constant 0 : i32
    return %c0_i32, %c0_i32_0, %c0_i32_1 : i32, i32, i32
  }
  func.func @transform_6(%arg0: i32) -> (i32, i32) {
    %c0_i32 = arith.constant 0 : i32
    %c0_i32_0 = arith.constant 0 : i32
    %c0_i32_1 = arith.constant 0 : i32
    return %c0_i32, %c0_i32_0 : i32, i32
  }
  func.func @transform_7(%arg0: i32) -> (i32, i32, i32) {
    %c0_i32 = arith.constant 0 : i32
    %c0_i32_0 = arith.constant 0 : i32
    %c0_i32_1 = arith.constant 0 : i32
    return %arg0, %c0_i32, %c0_i32_0 : i32, i32, i32
  }
}

</mosaic_0001>

<bundles_post_ra>
// kernel: tpu_custom_call.1
= control target key start
LH: loop header
LB: loop body
LE: loop exit
PB: predicated region body
PF: predicated region fallthrough
CT: control target
= control target key end

     0   :  { %12 = vsyncpa [#allocation3], 0  ;;  %s4774_s0 = inlined_call_operand.vmem [shape: f32[8,8,32], index: 0, kind: input, shape index: {}]   ;;  %s4775_s1 = inlined_call_operand.vmem [shape: f32[8,8,32], index: 1, kind: input, shape index: {}]   ;;  %s4776_s2 = inlined_call_operand.vmem [shape: f32[8,8,32], index: 2, kind: input, shape index: {}]   ;;  %s4777_s3 = inlined_call_operand.vmem [shape: bf16[12,32,8], index: 3, kind: input, shape index: {}]   ;;  %s4778_s4 = inlined_call_operand.vmem [shape: f32[12,1,8], index: 4, kind: input, shape index: {}]   ;;  %s4779_s5 = inlined_call_operand.vmem [shape: bf16[4,8,32], index: 5, kind: input, shape index: {}]   ;;  %s4780_s6 = inlined_call_operand.vmem [shape: f32[1,32], index: 6, kind: input, shape index: {}]   ;;  %s4781_s7 = inlined_call_operand.hbm [shape: f32[8,8,32], index: 7, kind: output, shape index: {}]  }
   0x1   :  { %14 = vsyncpa [#allocation3 + $0x1], 0  ;;  %s4216_s24 = smov 0   ;;  %s4218_s25 = smov 0  }
   0x2   :  { %s4220_s26 = smov 0   ;;  %s4222_s27 = smov 0  }
   0x3 LB: > { %s4237_s28 = sadd.s32 4294967295, %s4169_s27   ;;  %s3348_s29 = sadd.s32 4294967294, %s4169_s27   ;;  %s4169_s27 = sphi %s4222_s27, %s4787_s27   ;;  %s4165_s26 = sphi %s4220_s26, %s4786_s26   ;;  %s4161_s25 = sphi %s4218_s25, %s4785_s25   ;;  %s4157_s24 = sphi %s4216_s24, %s4784_s24  }
   0x4   : > { %s4241_s30 = sadd.s32 1, %s4169_s27   ;;  %s189_s8 = sadd.s32 1, %s4165_s26 }
   0x5   : > { %s186_s9 = ssub.s32 %s4169_s27, %s4241_s30  ;;  %p199_p0 = scmp.ne.s32.totalorder %s4165_s26, %s4161_s25 }
   0x6   : > { %p187_p1 = scmp.eq.s32.totalorder %s186_s9, 0  ;;  %p200_p2 = scmp.eq.s32.totalorder %s4237_s28, 1 }
   0x7   : > { %p205_p3 = scmp.ne.s32.totalorder %s4161_s25, %s4157_s24  ;;  %p206_p4 = scmp.eq.s32.totalorder %s3348_s29, 1 }
   0x8   : > { %s4252_s10 = scalar_select %p187_p1, %s4165_s26, %s189_s8  }
   0x9   : > { %p4254_p5 = por %p200_p2, %p199_p0  ;;  %p4258_p6 = por %p206_p4, %p205_p3 }
   0xa   : > { %p3351_p7 = scmp.ge.s32.totalorder %s4169_s27, 1  ;;  %p263_p8 = scmp.lt.s32.totalorder %s4169_s27, 3 }
   0xc   : > { %p264_p9 = pnand %p3351_p7, %p263_p8 }
   0xd   : > { %v4019_v0 = vld [vmem:[%s4777_s3] sm:$0xff] (!%p264_p9)   ;;  %s3353_s15 = sshll.u32 (!%p264_p9), %s4237_s28, 2  ;;  %v4020_v1 = vld [vmem:[%s4777_s3 + $0x8] sm:$0xff] (!%p264_p9)   ;;  %vm376_vm0 = vcmask (!%p264_p9), 261120   ;;  %v4171_v24 = vmov (!%p264_p9), 0.0   ;;  %vm4172_vm1 = vmmov (!%p264_p9), 0  }
   0xe   : > { %267 = sbr.rel (%p264_p9) target bundleno = 3580 (0xdfc), region = 48  ;;  %p306_p10 = scmp.lt.s32.totalorder (!%p264_p9), %s3353_s15, 7  ;;  %3648 = vmatprep.subr.bf16.mxu1 (!%p264_p9), %v4019_v0  ;;  %v4021_v2 = vld [vmem:[%s4777_s3 + $0x40] sm:$0xff] (!%p264_p9)   ;;  %v4022_v11 = vld [vmem:[%s4777_s3 + $0x48] sm:$0xff] (!%p264_p9)   ;;  %vm594_vm2 = vcmask (!%p264_p9), 64512   ;;  %vm834_vm3 = vcmask (!%p264_p9), 1043456  }
   0xf   : > { %3649 = vmatpush3.bf16.msra.mxu1 (!%p264_p9), %v4019_v0  ;;  %v4023_v16 = vld [vmem:[%s4777_s3 + $0x80] sm:$0xff] (!%p264_p9)   ;;  %v4024_v17 = vld [vmem:[%s4777_s3 + $0x88] sm:$0xff] (!%p264_p9)   ;;  %s302_s21 = sand.u32 (!%p264_p9), 1, %s4161_s25   ;;  %s4173_s17 = smov (!%p264_p9), [#allocation2]  }
  0x10   : > { %3650 = vmatprep.subr.bf16.mxu1 (!%p264_p9), %v4020_v1  ;;  %3664 = vmatprep.subr.bf16.mxu0 (!%p264_p9), %v4023_v16  ;;  %v3373_v29 = vld [vmem:[%s4778_s4 + $0x4] ss:$0 sm:$0xff] (!%p264_p9)  ;;  %v3367_v37 = vld [vmem:[%s4778_s4] ss:$0 sm:$0xff] (!%p264_p9)  ;;  %v3379_v55 = vld [vmem:[%s4778_s4 + $0x8] ss:$0 sm:$0xff] (!%p264_p9) }
  0x11   : > { %3665 = vmatpush3.bf16.msra.mxu0 (!%p264_p9), %v4023_v16  ;;  %s4111_s18 = sshll.u32 (!%p264_p9), %s4173_s17, 4  ;;  %s4112_s18 = int_to_ptr.vmem [resolvable:$false] %s4111_s18 }
  0x12   : > { %3666 = vmatprep.subr.bf16.mxu0 (!%p264_p9), %v4024_v17  ;;  %s4113_s19 = scalar_lea.vmem (!%p264_p9), %s4112_s18, 1024 }
  0x13   : > { %3651 = vmatpush3.bf16.msra.mxu1 (!%p264_p9), %v4020_v1 }
  0x14   : > { %3656 = vmatprep.subr.bf16.mxu1 (!%p264_p9), %v4021_v2 }
  0x15   : > { %s4789_s15 = smov (!%p306_p10, %s3353_s15), 7  ;;  %3667 = vmatpush3.bf16.msra.mxu0 %v4024_v17 }
  0x16   : > { %s4274_s20 = sshll.u32 %s4789_s15, 3  ;;  %3678 = vmatprep.subr.bf16.mxu0 %v4171_v24 }
  0x17   : > { %s309_s23 = scalar_lea.vmem %s4774_s0, %s4274_s20  ;;  %s315_s9 = scalar_lea.vmem %s4775_s1, %s4274_s20 }
  0x18   : > { %v325_v3 = vld [vmem:[%s309_s23] sm:$0xff]  ;;  %v326_v4 = vld [vmem:[%s309_s23 + $0x8] sm:$0xff]  ;;  %v327_v5 = vld [vmem:[%s309_s23 + $0x10] sm:$0xff]  ;;  %s321_s22 = scalar_lea.vmem %s4776_s2, %s4274_s20 }
  0x19   : > { %v4284_v6 = vpack.c.bf16 %v326_v4, %v325_v3  ;;  %v328_v7 = vld [vmem:[%s309_s23 + $0x18] sm:$0xff]  ;;  %v331_v8 = vld [vmem:[%s315_s9] sm:$0xff]  ;;  %v332_v9 = vld [vmem:[%s315_s9 + $0x8] sm:$0xff] }
  0x1a   : > { %v4286_v10 = vpack.c.bf16 %v328_v7, %v327_v5  ;;  %v4291_v12 = vpack.c.bf16 %v332_v9, %v331_v8  ;;  %v333_v13 = vld [vmem:[%s315_s9 + $0x10] sm:$0xff]  ;;  %v334_v14 = vld [vmem:[%s315_s9 + $0x18] sm:$0xff]  ;;  %v337_v18 = vld [vmem:[%s321_s22] sm:$0xff]  ;;  %s3523_s9 = sshll.u32 %s4237_s28, 9  ;;  %s4733_s28 = scalar_lea.sflag [#allocation3], %s302_s21 }
  0x1b   : > { %3652 = vmatprep.mubr.msk.bf16.mxu1 %vm376_vm0, %v4284_v6  ;;  %v4299_v15 = vpack.c.bf16 %v334_v14, %v333_v13  ;;  %v338_v19 = vld [vmem:[%s321_s22 + $0x8] sm:$0xff]  ;;  %v339_v21 = vld [vmem:[%s321_s22 + $0x10] sm:$0xff]  ;;  %v340_v22 = vld [vmem:[%s321_s22 + $0x18] sm:$0xff]  ;;  %s3352_s22 = sshll.u32 %s302_s21, 5  ;;  %s4729_s15 = scalar_lea.hbm %s4781_s7, %s3523_s9 }
  0x1c   : > { %3653 = vmatmul.mubr.msk.bf16.vlgmr.msra.gmra.mrb[0].mxu1 %vm376_vm0, %v4286_v10  ;;  %v4313_v20 = vpack.c.bf16 %v338_v19, %v337_v18  ;;  %v4315_v23 = vpack.c.bf16 %v340_v22, %v339_v21  ;;  %s304_s29 = scalar_lea.vmem [#allocation2], %s3352_s22 }
  0x1d   : > { %3657 = vmatpush3.bf16.msra.mxu1 %v4021_v2  ;;  %3660 = vmatprep.mubr.msk.bf16.mxu1 %vm376_vm0, %v4291_v12  ;;  %s3262_s8 = sshll.u32 %s304_s29, 4  ;;  %s4723_s8 = int_to_ptr.vmem [resolvable:$true] %s3262_s8 }
  0x1e   : > { %3658 = vmatprep.subr.bf16.mxu1 %v4022_v11  ;;  %3668 = vmatprep.mubr.msk.bf16.mxu0 %vm376_vm0, %v4313_v20  ;;  %s4107_s16 = scalar_lea.vmem %s4723_s8, 512  ;;  %p4114_p0 = scmp.lt.s32.totalorder %s4723_s8, %s4112_s18 }
  0x1f   : > { %3669 = vmatmul.mubr.msk.bf16.vlgmr.msra.gmra.mrb[0].mxu0 %vm376_vm0, %v4315_v23  ;;  %p4108_p11 = scmp.ne.s32.totalorder %s4723_s8, %s4107_s16  ;;  %p4115_p1 = scmp.lt.s32.totalorder %s4113_s19, %s4107_s16 }
  0x20   : > { %3680 = vmatprep.mubr.msk.bf16.mxu0 %vm4172_vm1, %v4171_v24 }
  0x21   : > { %3659 = vmatpush3.bf16.msra.mxu1 %v4022_v11  ;;  %p4109_p12 = pnand %p4108_p11, %p4254_p5  ;;  %p4116_p2 = por %p4115_p1, %p4114_p0 }
  0x22   : > { %3672 = vmatprep.subr.bf16.mxu1 %v4171_v24 }
  0x23   : > { %p4110_p13 = pneg %p4109_p12 }
  0x24   : > { %3661 = vmatmul.mubr.msk.bf16.vlgmr.msra.gmra.mrb[4].mxu1 %vm376_vm0, %v4299_v15 }
  0x25   : > { %3674 = vmatprep.mubr.msk.bf16.mxu1 %vm4172_vm1, %v4171_v24  ;;  %p4117_p3 = pnand %p4116_p2, %p4110_p13 }
  0xef   : > { %v3654_v25 = vpop.f32.mrb[0].mxu1 }
  0xf0   : > { %v417_v26 = vpop.f32.mrb[1].mxu1  ;;  %v426_v50 = vadd.f32 %v3654_v25, %v3367_v37 }
  0xf1   : > { %v3655_v27 = vpop.f32.mrb[2].mxu1  ;;  %v418_v41 = vadd.f32 %v3367_v37, %v417_v26 }
  0xf2   : > { %v420_v28 = vpop.f32.mrb[3].mxu1  ;;  %v429_v52 = vadd.f32 %v3655_v27, %v3367_v37  ;;  %v584_v53 = vpack.c.bf16 %v426_v50, %v426_v50  ;;  %v3670_v56 = vpop.f32.mrb[0].mxu0 }
  0xf3   : > { %v421_v44 = vadd.f32 %v3367_v37, %v420_v28  ;;  %v582_v46 = vpack.c.bf16 %v418_v41, %v418_v41  ;;  %v4356_v57 = vadd.f32 %v3670_v56, %v3379_v55  ;;  %v567_v58 = vpop.f32.mrb[1].mxu0 }
  0xf4   : > { %v585_v54 = vpack.c.bf16 %v429_v52, %v429_v52  ;;  %v568_v59 = vadd.f32 %v3379_v55, %v567_v58  ;;  %v3671_v60 = vpop.f32.mrb[2].mxu0 }
  0xf5   : > { %v583_v48 = vpack.c.bf16 %v421_v44, %v421_v44  ;;  %v4358_v61 = vadd.f32 %v3671_v60, %v3379_v55  ;;  %v570_v62 = vpop.f32.mrb[3].mxu0 }
  0xf6   : > { %v590_v63 = vpack.c.bf16 %v568_v59, %v568_v59  ;;  %v571_v0 = vadd.f32 %v3379_v55, %v570_v62 }
  0xf7   : > { %v3662_v30 = vpop.f32.mrb[4].mxu1  ;;  %v593_v60 = vpack.c.bf16 %v4358_v61, %v4358_v61 }
  0xf8   : > { %v492_v31 = vpop.f32.mrb[5].mxu1  ;;  %v501_v38 = vadd.f32 %v3662_v30, %v3373_v29  ;;  %v836_v1 = vsel %vm834_vm3, %v590_v63, 0  ;;  %v591_v2 = vpack.c.bf16 %v571_v0, %v571_v0 }
  0xf9   : > { %v493_v32 = vadd.f32 %v3373_v29, %v492_v31  ;;  %v3663_v33 = vpop.f32.mrb[6].mxu1 }
  0xfa   : > { %v495_v34 = vpop.f32.mrb[7].mxu1  ;;  %v504_v42 = vadd.f32 %v3663_v33, %v3373_v29  ;;  %v588_v45 = vpack.c.bf16 %v501_v38, %v501_v38  ;;  %v882_v3 = vsel %vm834_vm3, %v591_v2, 0 }
  0xfb   : > { %v586_v35 = vpack.c.bf16 %v493_v32, %v493_v32  ;;  %v496_v36 = vadd.f32 %v3373_v29, %v495_v34 }
  0xfc   : > { %v589_v47 = vpack.c.bf16 %v504_v42, %v504_v42  ;;  %v691_v49 = vsel %vm594_vm2, %v588_v45, 0 }
  0xfd   : > { %v599_v39 = vsel %vm594_vm2, %v586_v35, 0  ;;  %v587_v40 = vpack.c.bf16 %v496_v36, %v496_v36 }
  0xfe   : > { %3673 = vmatpush3.bf16.xpose.msra.mxu1 %v599_v39  ;;  %v737_v51 = vsel %vm594_vm2, %v589_v47, 0 }
  0xff   : > { %v645_v43 = vsel %vm594_vm2, %v587_v40, 0  ;;  %3684 = vmatprep.subr.bf16.mxu1 %v4171_v24 }
 0x100   : > { %3679 = vmatpush3.bf16.xpose.msra.mxu0 %v645_v43 }
 0x101   : > { %3690 = vmatprep.subr.bf16.mxu0 %v4171_v24 }
 0x105   : > { %3675 = vmatmul.mubr.msk.bf16.vlgmr.msra.gmra.mrb[8].mxu1 %vm594_vm2, %v582_v46 }
 0x106   : > { %3685 = vmatpush3.bf16.xpose.msra.mxu1 %v691_v49  ;;  %3686 = vmatprep.mubr.msk.bf16.mxu1 %vm4172_vm1, %v4171_v24 }
 0x107   : > { %3681 = vmatmul.mubr.msk.bf16.vlgmr.msra.gmra.mrb[4].mxu0 %vm594_vm2, %v583_v48  ;;  %3696 = vmatprep.subr.bf16.mxu1 %v4171_v24 }
 0x108   : > { %3691 = vmatpush3.bf16.xpose.msra.mxu0 %v737_v51  ;;  %3692 = vmatprep.mubr.msk.bf16.mxu0 %vm4172_vm1, %v4171_v24 }
 0x109   : > { %3702 = vmatprep.subr.bf16.mxu0 %v4171_v24 }
 0x10d   : > { %3687 = vmatmul.mubr.msk.bf16.vlgmr.msra.gmra.mrb[12].mxu1 %vm594_vm2, %v584_v53 }
 0x10e   : > { %3698 = vmatprep.mubr.msk.bf16.mxu1 %vm4172_vm1, %v4171_v24  ;;  %3697 = vmatpush3.bf16.msra.mxu1 %v836_v1  ;;  %v4025_v1 = vld [vmem:[%s4777_s3 + $0x50] sm:$0xff]  }
 0x10f   : > { %3693 = vmatmul.mubr.msk.bf16.vlgmr.msra.gmra.mrb[8].mxu0 %vm594_vm2, %v585_v54  ;;  %3708 = vmatprep.subr.bf16.mxu1 %v4171_v24 }
 0x110   : > { %3704 = vmatprep.mubr.msk.bf16.mxu0 %vm4172_vm1, %v4171_v24  ;;  %3703 = vmatpush3.bf16.msra.mxu0 %v882_v3  ;;  %v592_v3 = vpack.c.bf16 %v4356_v57, %v4356_v57 }
 0x111   : > { %3714 = vmatprep.subr.bf16.mxu0 %v4171_v24 }
 0x1d8   : > { %v635_v4 = vpop.f32.mrb[8].mxu1 }
 0x1d9   : > { %v3676_v5 = vpop.f32.mrb[9].mxu1  ;;  %v779_v16 = vmul.f32 0.35355338, %v635_v4  ;;  %v974_v4 = vsel %vm834_vm3, %v593_v60, 0 }
 0x1da   : > { %v638_v7 = vpop.f32.mrb[10].mxu1  ;;  %v681_v8 = vpop.f32.mrb[4].mxu0 }
 0x1db   : > { %v780_v9 = vmul.f32 0.35355338, %v681_v8  ;;  %v3677_v11 = vpop.f32.mrb[11].mxu1  ;;  %v3682_v13 = vpop.f32.mrb[5].mxu0  ;;  %v783_v22 = vsel %vm594_vm2, %v779_v16, -inf  ;;  %v4027_v7 = vld [vmem:[%s4777_s3 + $0x10] sm:$0xff]  }
 0x1dc   : > { %v684_v14 = vpop.f32.mrb[6].mxu0  ;;  %v4026_v13 = vld [vmem:[%s4777_s3 + $0x58] sm:$0xff]  }
 0x1dd   : > { %v3683_v17 = vpop.f32.mrb[7].mxu0  ;;  %v786_v18 = vsel %vm594_vm2, %v780_v9, -inf }
 0x1de   : > { %787 = vmax.xlane.f32.xlu0 %v786_v18  ;;  %v4028_v18 = vld [vmem:[%s4777_s3 + $0x18] sm:$0xff]  }
 0x1e0   : > { %v727_v19 = vpop.f32.mrb[12].mxu1 }
 0x1e1   : > { %v3688_v21 = vpop.f32.mrb[13].mxu1  ;;  %v781_v31 = vmul.f32 0.35355338, %v727_v19  ;;  %v4029_v19 = vld [vmem:[%s4777_s3 + $0x90] sm:$0xff]  }
 0x1e2   : > { %v773_v25 = vpop.f32.mrb[8].mxu0  ;;  %784 = vmax.xlane.f32.xlu0 %v783_v22  ;;  %v730_v26 = vpop.f32.mrb[14].mxu1  ;;  %v4030_v21 = vld [vmem:[%s4777_s3 + $0x98] sm:$0xff]  }
 0x1e3   : > { %v782_v27 = vmul.f32 0.35355338, %v773_v25  ;;  %v3689_v28 = vpop.f32.mrb[15].mxu1  ;;  %v3694_v29 = vpop.f32.mrb[9].mxu0  ;;  %v789_v34 = vsel %vm594_vm2, %v781_v31, -inf }
 0x1e4   : > { %v776_v30 = vpop.f32.mrb[10].mxu0 }
 0x1e5   : > { %v3695_v32 = vpop.f32.mrb[11].mxu0  ;;  %v792_v33 = vsel %vm594_vm2, %v782_v27, -inf }
 0x1e6   : > { %793 = vmax.xlane.f32.xlu1 %v792_v33 }
 0x1ea   : > { %790 = vmax.xlane.f32.xlu1 %v789_v34 }
 0x26b   : > { %v788_v35 = vpop.xlane.xlu0 %787 }
 0x26c   : > { %v796_v36 = vsub.f32 %v780_v9, %v788_v35  ;;  %v928_v9 = vsel %vm834_vm3, %v592_v3, 0 }
 0x26e   : > { %v801_v37 = vmul.f32 1.442695, %v796_v36 }
 0x26f   : > { %v785_v38 = vpop.xlane.xlu0 %784 }
 0x270   : > { %4043 = vpow2.f32 %v801_v37  ;;  %v795_v39 = vsub.f32 %v779_v16, %v785_v38 }
 0x272   : > { %v799_v40 = vmul.f32 1.442695, %v795_v39 }
 0x273   : > { %v794_v41 = vpop.xlane.xlu1 %793 }
 0x274   : > { %4045 = vpow2.f32 %v799_v40  ;;  %v798_v42 = vsub.f32 %v782_v27, %v794_v41 }
 0x276   : > { %v805_v43 = vmul.f32 1.442695, %v798_v42  ;;  %v3411_v42 = vld [vmem:[%s4778_s4 + $0x5] ss:$0 sm:$0xff] }
 0x277   : > { %v791_v44 = vpop.xlane.xlu1 %790 }
 0x278   : > { %4047 = vpow2.f32 %v805_v43  ;;  %v797_v45 = vsub.f32 %v781_v31, %v791_v44 }
 0x27a   : > { %v4044_v46 = vpop.eup %4043  ;;  %v803_v47 = vmul.f32 1.442695, %v797_v45 }
 0x27b   : > { %v810_v48 = vsel %vm594_vm2, %v4044_v46, 0.0 }
 0x27c   : > { %4049 = vpow2.f32 %v803_v47  ;;  %811 = vadd.xlane.f32.xlu0 %v810_v48  ;;  %v3405_v48 = vld [vmem:[%s4778_s4 + $0x1] ss:$0 sm:$0xff] }
 0x27e   : > { %v4046_v49 = vpop.eup %4045 }
 0x27f   : > { %v807_v50 = vsel %vm594_vm2, %v4046_v49, 0.0 }
 0x280   : > { %808 = vadd.xlane.f32.xlu1 %v807_v50 }
 0x282   : > { %v4048_v51 = vpop.eup %4047 }
 0x283   : > { %v816_v52 = vsel %vm594_vm2, %v4048_v51, 0.0 }
 0x284   : > { %817 = vadd.xlane.f32.xlu0 %v816_v52 }
 0x286   : > { %v4050_v53 = vpop.eup %4049 }
 0x287   : > { %v813_v54 = vsel %vm594_vm2, %v4050_v53, 0.0 }
 0x288   : > { %814 = vadd.xlane.f32.xlu1 %v813_v54 }
 0x309   : > { %v812_v55 = vpop.xlane.xlu0 %811 }
 0x30a   : > { %4051 = vrcp.f32 %v812_v55 }
 0x30d   : > { %v809_v56 = vpop.xlane.xlu1 %808 }
 0x30e   : > { %4053 = vrcp.f32 %v809_v56 }
 0x311   : > { %v818_v58 = vpop.xlane.xlu0 %817 }
 0x312   : > { %4055 = vrcp.f32 %v818_v58 }
 0x314   : > { %v4052_v59 = vpop.eup %4051 }
 0x315   : > { %v824_v62 = vmul.f32 %v4052_v59, %v4044_v46  ;;  %v815_v63 = vpop.xlane.xlu1 %814 }
 0x316   : > { %4057 = vrcp.f32 %v815_v63 }
 0x317   : > { %v828_v0 = vpack.c.bf16 %v824_v62, %v824_v62 }
 0x318   : > { %v4054_v2 = vpop.eup %4053 }
 0x319   : > { %v823_v5 = vmul.f32 %v4054_v2, %v4046_v49  ;;  %3705 = vmatmul.mubr.msk.bf16.vlgmr.msra.gmra.mrb[12].mxu0 %vm594_vm2, %v828_v0 }
 0x31a   : > { %3715 = vmatpush3.bf16.msra.mxu0 %v974_v4  ;;  %3716 = vmatprep.mubr.msk.bf16.mxu0 %vm4172_vm1, %v4171_v24 }
 0x31b   : > { %v827_v61 = vpack.c.bf16 %v823_v5, %v823_v5  ;;  %3728 = vmatprep.subr.bf16.mxu0 %v4025_v1 }
 0x31c   : > { %v4056_v8 = vpop.eup %4055 }
 0x31d   : > { %v826_v11 = vmul.f32 %v4056_v8, %v4048_v51  ;;  %3699 = vmatmul.mubr.msk.bf16.vlgmr.msra.gmra.mrb[16].mxu1 %vm594_vm2, %v827_v61 }
 0x31e   : > { %3709 = vmatpush3.bf16.msra.mxu1 %v928_v9  ;;  %3710 = vmatprep.mubr.msk.bf16.mxu1 %vm4172_vm1, %v4171_v24 }
 0x31f   : > { %v830_v57 = vpack.c.bf16 %v826_v11, %v826_v11  ;;  %3720 = vmatprep.subr.bf16.mxu1 %v4027_v7  ;;  %v3417_v11 = vld [vmem:[%s4778_s4 + $0x9] ss:$0 sm:$0xff] }
 0x320   : > { %v4058_v14 = vpop.eup %4057 }
 0x321   : > { %v825_v16 = vmul.f32 %v4058_v14, %v4050_v53  ;;  %3717 = vmatmul.mubr.msk.bf16.vlgmr.msra.gmra.mrb[16].mxu0 %vm594_vm2, %v830_v57 }
 0x322   : > { %3729 = vmatpush3.bf16.msra.mxu0 %v4025_v1  ;;  %3732 = vmatprep.mubr.msk.bf16.mxu0 %vm376_vm0, %v4291_v12 }
 0x323   : > { %v829_v17 = vpack.c.bf16 %v825_v16, %v825_v16  ;;  %3730 = vmatprep.subr.bf16.mxu0 %v4026_v13 }
 0x325   : > { %3711 = vmatmul.mubr.msk.bf16.vlgmr.msra.gmra.mrb[20].mxu1 %vm594_vm2, %v829_v17 }
 0x326   : > { %3731 = vmatpush3.bf16.msra.mxu0 %v4026_v13  ;;  %3721 = vmatpush3.bf16.msra.mxu1 %v4027_v7 }
 0x327   : > { %3722 = vmatprep.subr.bf16.mxu1 %v4028_v18  ;;  %3724 = vmatprep.mubr.msk.bf16.mxu1 %vm376_vm0, %v4284_v6 }
 0x328   : > { %3744 = vmatprep.subr.bf16.mxu0 %v4171_v24 }
 0x329   : > { %3733 = vmatmul.mubr.msk.bf16.vlgmr.msra.gmra.mrb[20].mxu0 %vm376_vm0, %v4299_v15 }
 0x32a   : > { %3723 = vmatpush3.bf16.msra.mxu1 %v4028_v18  ;;  %3746 = vmatprep.mubr.msk.bf16.mxu0 %vm4172_vm1, %v4171_v24 }
 0x32b   : > { %3736 = vmatprep.subr.bf16.mxu1 %v4029_v19 }
 0x32d   : > { %3725 = vmatmul.mubr.msk.bf16.vlgmr.msra.gmra.mrb[24].mxu1 %vm376_vm0, %v4286_v10 }
 0x32e   : > { %3740 = vmatprep.mubr.msk.bf16.mxu1 %vm376_vm0, %v4313_v20  ;;  %3737 = vmatpush3.bf16.msra.mxu1 %v4029_v19 }
 0x32f   : > { %3738 = vmatprep.subr.bf16.mxu1 %v4030_v21 }
 0x332   : > { %3739 = vmatpush3.bf16.msra.mxu1 %v4030_v21 }
 0x333   : > { %3750 = vmatprep.subr.bf16.mxu1 %v4171_v24 }
 0x335   : > { %3741 = vmatmul.mubr.msk.bf16.vlgmr.msra.gmra.mrb[28].mxu1 %vm376_vm0, %v4315_v23 }
 0x336   : > { %3752 = vmatprep.mubr.msk.bf16.mxu1 %vm4172_vm1, %v4171_v24 }
 0x3ec   : > { %v4422_v22 = vpop.f32.mrb[12].mxu0 }
 0x3ed   : > { %v3706_v25 = vpop.f32.mrb[13].mxu0 }
 0x3ee   : > { %v921_v26 = vpop.f32.mrb[14].mxu0 }
 0x3ef   : > { %v3707_v27 = vpop.f32.mrb[15].mxu0 }
 0x3f0   : > { %v4424_v28 = vpop.f32.mrb[16].mxu1 }
 0x3f1   : > { %v1016_v29 = vpack.c.bf16 %v4422_v22, %v4424_v28  ;;  %v3700_v30 = vpop.f32.mrb[17].mxu1  ;;  %v3454_v22 = vld [vmem:[%s4778_s4 + $0x6] ss:$0 sm:$0xff] }
 0x3f2   : > { %v875_v31 = vpop.f32.mrb[18].mxu1 }
 0x3f3   : > { %v3701_v32 = vpop.f32.mrb[19].mxu1 }
 0x3f4   : > { %v4428_v33 = vpop.f32.mrb[16].mxu0 }
 0x3f5   : > { %v3718_v34 = vpop.f32.mrb[17].mxu0 }
 0x3f6   : > { %v1013_v35 = vpop.f32.mrb[18].mxu0 }
 0x3f7   : > { %v3719_v36 = vpop.f32.mrb[19].mxu0 }
 0x3f8   : > { %v4430_v37 = vpop.f32.mrb[20].mxu1 }
 0x3f9   : > { %v1017_v38 = vpack.c.bf16 %v4428_v33, %v4430_v37  ;;  %v3712_v39 = vpop.f32.mrb[21].mxu1  ;;  %v3448_v33 = vld [vmem:[%s4778_s4 + $0x2] ss:$0 sm:$0xff] }
 0x3fa   : > { %v967_v40 = vpop.f32.mrb[22].mxu1 }
 0x3fb   : > { %v3713_v41 = vpop.f32.mrb[23].mxu1 }
 0x3fc   : > { %v3734_v43 = vpop.f32.mrb[20].mxu0 }
 0x3fd   : > { %v1157_v44 = vpop.f32.mrb[21].mxu0  ;;  %v1166_v53 = vadd.f32 %v3734_v43, %v3411_v42 }
 0x3fe   : > { %v1158_v45 = vadd.f32 %v3411_v42, %v1157_v44  ;;  %v3735_v46 = vpop.f32.mrb[22].mxu0 }
 0x3ff   : > { %v1160_v47 = vpop.f32.mrb[23].mxu0  ;;  %v1169_v60 = vadd.f32 %v3735_v46, %v3411_v42  ;;  %v1247_v63 = vpack.c.bf16 %v1166_v53, %v1166_v53 }
 0x400   : > { %v1245_v49 = vpack.c.bf16 %v1158_v45, %v1158_v45  ;;  %v1161_v50 = vadd.f32 %v3411_v42, %v1160_v47  ;;  %v3726_v51 = vpop.f32.mrb[24].mxu1 }
 0x401   : > { %v1088_v52 = vpop.f32.mrb[25].mxu1  ;;  %v1248_v2 = vpack.c.bf16 %v1169_v60, %v1169_v60  ;;  %v1349_v3 = vsel %vm594_vm2, %v1247_v63, 0  ;;  %v1097_v61 = vadd.f32 %v3726_v51, %v3405_v48 }
 0x402   : > { %v1257_v54 = vsel %vm594_vm2, %v1245_v49, 0  ;;  %v1246_v55 = vpack.c.bf16 %v1161_v50, %v1161_v50  ;;  %v1089_v56 = vadd.f32 %v3405_v48, %v1088_v52  ;;  %v3727_v58 = vpop.f32.mrb[26].mxu1 }
 0x403   : > { %3745 = vmatpush3.bf16.xpose.msra.mxu0 %v1257_v54  ;;  %v1091_v59 = vpop.f32.mrb[27].mxu1  ;;  %v1395_v5 = vsel %vm594_vm2, %v1248_v2, 0  ;;  %v1100_v7 = vadd.f32 %v3727_v58, %v3405_v48  ;;  %v1243_v8 = vpack.c.bf16 %v1097_v61, %v1097_v61 }
 0x404   : > { %v1303_v62 = vsel %vm594_vm2, %v1246_v55, 0  ;;  %3756 = vmatprep.subr.bf16.mxu0 %v4171_v24  ;;  %v1241_v0 = vpack.c.bf16 %v1089_v56, %v1089_v56  ;;  %v1092_v1 = vadd.f32 %v3405_v48, %v1091_v59 }
 0x405   : > { %3751 = vmatpush3.bf16.xpose.msra.mxu1 %v1303_v62  ;;  %v1244_v9 = vpack.c.bf16 %v1100_v7, %v1100_v7 }
 0x406   : > { %3762 = vmatprep.subr.bf16.mxu1 %v4171_v24  ;;  %v1242_v4 = vpack.c.bf16 %v1092_v1, %v1092_v1 }
 0x408   : > { %v3742_v57 = vpop.f32.mrb[28].mxu1 }
 0x409   : > { %v4463_v13 = vadd.f32 %v3742_v57, %v3417_v11  ;;  %v1226_v14 = vpop.f32.mrb[29].mxu1 }
 0x40a   : > { %3747 = vmatmul.mubr.msk.bf16.vlgmr.msra.gmra.mrb[24].mxu0 %vm594_vm2, %v1241_v0  ;;  %v1227_v16 = vadd.f32 %v3417_v11, %v1226_v14  ;;  %v3743_v17 = vpop.f32.mrb[30].mxu1 }
 0x40b   : > { %3757 = vmatpush3.bf16.xpose.msra.mxu0 %v1349_v3  ;;  %3758 = vmatprep.mubr.msk.bf16.mxu0 %vm4172_vm1, %v4171_v24  ;;  %v4465_v18 = vadd.f32 %v3743_v17, %v3417_v11  ;;  %v1229_v19 = vpop.f32.mrb[31].mxu1 }
 0x40c   : > { %3753 = vmatmul.mubr.msk.bf16.vlgmr.msra.gmra.mrb[32].mxu1 %vm594_vm2, %v1242_v4  ;;  %3768 = vmatprep.subr.bf16.mxu0 %v4171_v24  ;;  %v1249_v21 = vpack.c.bf16 %v1227_v16, %v1227_v16  ;;  %v1230_v25 = vadd.f32 %v3417_v11, %v1229_v19 }
 0x40d   : > { %3763 = vmatpush3.bf16.xpose.msra.mxu1 %v1395_v5  ;;  %3764 = vmatprep.mubr.msk.bf16.mxu1 %vm4172_vm1, %v4171_v24 }
 0x40e   : > { %3774 = vmatprep.subr.bf16.mxu1 %v4171_v24  ;;  %v1493_v26 = vsel %vm834_vm3, %v1249_v21, 0  ;;  %v1250_v27 = vpack.c.bf16 %v1230_v25, %v1230_v25 }
 0x410   : > { %v1539_v30 = vsel %vm834_vm3, %v1250_v27, 0 }
 0x412   : > { %3759 = vmatmul.mubr.msk.bf16.vlgmr.msra.gmra.mrb[28].mxu0 %vm594_vm2, %v1243_v8 }
 0x413   : > { %3770 = vmatprep.mubr.msk.bf16.mxu0 %vm4172_vm1, %v4171_v24  ;;  %3769 = vmatpush3.bf16.msra.mxu0 %v1493_v26 }
 0x414   : > { %3765 = vmatmul.mubr.msk.bf16.vlgmr.msra.gmra.mrb[36].mxu1 %vm594_vm2, %v1244_v9  ;;  %3780 = vmatprep.subr.bf16.mxu0 %v4171_v24 }
 0x415   : > { %3776 = vmatprep.mubr.msk.bf16.mxu1 %vm4172_vm1, %v4171_v24  ;;  %3775 = vmatpush3.bf16.msra.mxu1 %v1539_v30 }
 0x416   : > { %3786 = vmatprep.subr.bf16.mxu1 %v4171_v24 }
 0x4dd   : > { %v1293_v31 = vpop.f32.mrb[24].mxu0 }
 0x4de   : > { %v1437_v32 = vmul.f32 0.35355338, %v1293_v31  ;;  %v3748_v34 = vpop.f32.mrb[25].mxu0  ;;  %v1251_v31 = vpack.c.bf16 %v4463_v13, %v4463_v13 }
 0x4df   : > { %v1296_v35 = vpop.f32.mrb[26].mxu0  ;;  %v1339_v36 = vpop.f32.mrb[32].mxu1 }
 0x4e0   : > { %v1438_v39 = vmul.f32 0.35355338, %v1339_v36  ;;  %v3749_v40 = vpop.f32.mrb[27].mxu0  ;;  %v3754_v41 = vpop.f32.mrb[33].mxu1  ;;  %v1441_v42 = vsel %vm594_vm2, %v1437_v32, -inf  ;;  %v1252_v35 = vpack.c.bf16 %v4465_v18, %v4465_v18 }
 0x4e1   : > { %v1342_v43 = vpop.f32.mrb[34].mxu1  ;;  %1442 = vmax.xlane.f32.xlu1 %v1441_v42  ;;  %v1585_v40 = vsel %vm834_vm3, %v1251_v31, 0  ;;  %v4031_v42 = vld [vmem:[%s4777_s3 + $0x20] sm:$0xff]  }
 0x4e2   : > { %v3755_v44 = vpop.f32.mrb[35].mxu1  ;;  %v1444_v45 = vsel %vm594_vm2, %v1438_v39, -inf  ;;  %v1631_v13 = vsel %vm834_vm3, %v1252_v35, 0 }
 0x4e3   : > { %1445 = vmax.xlane.f32.xlu0 %v1444_v45 }
 0x4e5   : > { %v1385_v46 = vpop.f32.mrb[28].mxu0 }
 0x4e6   : > { %v1439_v47 = vmul.f32 0.35355338, %v1385_v46  ;;  %v3760_v48 = vpop.f32.mrb[29].mxu0 }
 0x4e7   : > { %v1388_v49 = vpop.f32.mrb[30].mxu0  ;;  %v1431_v50 = vpop.f32.mrb[36].mxu1  ;;  %v4032_v48 = vld [vmem:[%s4777_s3 + $0x28] sm:$0xff]  }
 0x4e8   : > { %v1440_v51 = vmul.f32 0.35355338, %v1431_v50  ;;  %v3761_v52 = vpop.f32.mrb[31].mxu0  ;;  %v3766_v53 = vpop.f32.mrb[37].mxu1  ;;  %v1447_v54 = vsel %vm594_vm2, %v1439_v47, -inf  ;;  %v4033_v49 = vld [vmem:[%s4777_s3 + $0x60] sm:$0xff]  }
 0x4e9   : > { %v1434_v55 = vpop.f32.mrb[38].mxu1  ;;  %1448 = vmax.xlane.f32.xlu1 %v1447_v54  ;;  %v4034_v50 = vld [vmem:[%s4777_s3 + $0x68] sm:$0xff]   ;;  %v1018_v53 = vld [vmem:[%s4779_s5] sm:$0xf] }
 0x4ea   : > { %v3767_v56 = vpop.f32.mrb[39].mxu1  ;;  %v1450_v58 = vsel %vm594_vm2, %v1440_v51, -inf }
 0x4eb   : > { %1451 = vmax.xlane.f32.xlu0 %v1450_v58 }
 0x56e   : > { %v1443_v59 = vpop.xlane.xlu1 %1442 }
 0x56f   : > { %v1453_v60 = vsub.f32 %v1437_v32, %v1443_v59 }
 0x570   : > { %v1446_v62 = vpop.xlane.xlu0 %1445 }
 0x571   : > { %v1457_v63 = vmul.f32 1.442695, %v1453_v60  ;;  %v1454_v0 = vsub.f32 %v1438_v39, %v1446_v62 }
 0x573   : > { %4059 = vpow2.f32 %v1457_v63  ;;  %v1459_v1 = vmul.f32 1.442695, %v1454_v0 }
 0x575   : > { %4061 = vpow2.f32 %v1459_v1 }
 0x576   : > { %v1449_v2 = vpop.xlane.xlu1 %1448 }
 0x577   : > { %v1455_v3 = vsub.f32 %v1439_v47, %v1449_v2 }
 0x578   : > { %v1452_v4 = vpop.xlane.xlu0 %1451 }
 0x579   : > { %v1461_v5 = vmul.f32 1.442695, %v1455_v3  ;;  %v1456_v61 = vsub.f32 %v1440_v51, %v1452_v4  ;;  %v3430_v51 = vld [vmem:[%s4779_s5 + $0x4] sm:$0xf] }
 0x57a   : > { %v1684_v52 = vsel %vm834_vm3, %v3430_v51, 0 }
 0x57b   : > { %4063 = vpow2.f32 %v1461_v5  ;;  %v1463_v7 = vmul.f32 1.442695, %v1456_v61 }
 0x57d   : > { %v4060_v8 = vpop.eup %4059  ;;  %4065 = vpow2.f32 %v1463_v7 }
 0x57e   : > { %v1465_v9 = vsel %vm594_vm2, %v4060_v8, 0.0 }
 0x57f   : > { %v4062_v11 = vpop.eup %4061  ;;  %1466 = vadd.xlane.f32.xlu1 %v1465_v9  ;;  %v4035_v9 = vld [vmem:[%s4777_s3 + $0xa0] sm:$0xff]  }
 0x580   : > { %v1468_v57 = vsel %vm594_vm2, %v4062_v11, 0.0 }
 0x581   : > { %1469 = vadd.xlane.f32.xlu0 %v1468_v57 }
 0x585   : > { %v4064_v14 = vpop.eup %4063 }
 0x586   : > { %v1471_v16 = vsel %vm594_vm2, %v4064_v14, 0.0 }
 0x587   : > { %v4066_v17 = vpop.eup %4065  ;;  %1472 = vadd.xlane.f32.xlu1 %v1471_v16 }
 0x588   : > { %v1474_v19 = vsel %vm594_vm2, %v4066_v17, 0.0 }
 0x589   : > { %1475 = vadd.xlane.f32.xlu0 %v1474_v19 }
 0x60c   : > { %v1467_v21 = vpop.xlane.xlu1 %1466 }
 0x60d   : > { %4067 = vrcp.f32 %v1467_v21  ;;  %v4036_v21 = vld [vmem:[%s4777_s3 + $0xa8] sm:$0xff]  }
 0x60e   : > { %v1470_v25 = vpop.xlane.xlu0 %1469 }
 0x60f   : > { %4069 = vrcp.f32 %v1470_v25 }
 0x614   : > { %v1473_v26 = vpop.xlane.xlu1 %1472 }
 0x615   : > { %4071 = vrcp.f32 %v1473_v26 }
 0x616   : > { %v1476_v27 = vpop.xlane.xlu0 %1475 }
 0x617   : > { %v4068_v30 = vpop.eup %4067  ;;  %4073 = vrcp.f32 %v1476_v27 }
 0x618   : > { %v1481_v32 = vmul.f32 %v4068_v30, %v4060_v8  ;;  %v1742_v8 = vsel %vm834_vm3, %v1018_v53, 0 }
 0x619   : > { %v4070_v34 = vpop.eup %4069 }
 0x61a   : > { %v1482_v36 = vmul.f32 %v4070_v34, %v4062_v11  ;;  %v1485_v39 = vpack.c.bf16 %v1481_v32, %v1481_v32 }
 0x61c   : > { %3771 = vmatmul.mubr.msk.bf16.vlgmr.msra.gmra.mrb[32].mxu0 %vm594_vm2, %v1485_v39  ;;  %v1486_v41 = vpack.c.bf16 %v1482_v36, %v1482_v36 }
 0x61d   : > { %3781 = vmatpush3.bf16.msra.mxu0 %v1585_v40  ;;  %3782 = vmatprep.mubr.msk.bf16.mxu0 %vm4172_vm1, %v4171_v24 }
 0x61e   : > { %3777 = vmatmul.mubr.msk.bf16.vlgmr.msra.gmra.mrb[40].mxu1 %vm594_vm2, %v1486_v41  ;;  %3972 = vmatprep.subr.msk.bf16.mxu0 %vm834_vm3, %v3430_v51 }
 0x61f   : > { %v4072_v18 = vpop.eup %4071  ;;  %3787 = vmatpush3.bf16.msra.mxu1 %v1631_v13  ;;  %3788 = vmatprep.mubr.msk.bf16.mxu1 %vm4172_vm1, %v4171_v24 }
 0x620   : > { %v1483_v43 = vmul.f32 %v4072_v18, %v4064_v14  ;;  %3804 = vmatprep.subr.bf16.mxu1 %v4031_v42 }
 0x621   : > { %v4074_v44 = vpop.eup %4073 }
 0x622   : > { %v1484_v45 = vmul.f32 %v4074_v44, %v4066_v17  ;;  %v1487_v46 = vpack.c.bf16 %v1483_v43, %v1483_v43 }
 0x624   : > { %3783 = vmatmul.mubr.msk.bf16.vlgmr.msra.gmra.mrb[36].mxu0 %vm594_vm2, %v1487_v46  ;;  %v1488_v47 = vpack.c.bf16 %v1484_v45, %v1484_v45 }
 0x625   : > { %3793 = vmatpush3.bf16.msra.mxu0 %v1684_v52 }
 0x626   : > { %3789 = vmatmul.mubr.msk.bf16.vlgmr.msra.gmra.mrb[44].mxu1 %vm594_vm2, %v1488_v47  ;;  %3973 = vmatprep.subr.msk.bf16.mxu0 %vm834_vm3, %v1018_v53 }
 0x627   : > { %3805 = vmatpush3.bf16.msra.mxu1 %v4031_v42  ;;  %3808 = vmatprep.mubr.msk.bf16.mxu1 %vm376_vm0, %v4284_v6 }
 0x628   : > { %3806 = vmatprep.subr.bf16.mxu1 %v4032_v48 }
 0x62b   : > { %3807 = vmatpush3.bf16.msra.mxu1 %v4032_v48  ;;  %v3460_v48 = vld [vmem:[%s4778_s4 + $0xa] ss:$0 sm:$0xff] }
 0x62c   : > { %3812 = vmatprep.subr.bf16.mxu1 %v4033_v49 }
 0x62e   : > { %3809 = vmatmul.mubr.msk.bf16.vlgmr.msra.gmra.mrb[48].mxu1 %vm376_vm0, %v4286_v10 }
 0x62f   : > { %3813 = vmatpush3.bf16.msra.mxu1 %v4033_v49  ;;  %3816 = vmatprep.mubr.msk.bf16.mxu1 %vm376_vm0, %v4291_v12 }
 0x630   : > { %3814 = vmatprep.subr.bf16.mxu1 %v4034_v50 }
 0x633   : > { %3815 = vmatpush3.bf16.msra.mxu1 %v4034_v50 }
 0x634   : > { %3828 = vmatprep.subr.bf16.mxu1 %v4171_v24 }
 0x636   : > { %3817 = vmatmul.mubr.msk.bf16.vlgmr.msra.gmra.mrb[52].mxu1 %vm376_vm0, %v4299_v15 }
 0x637   : > { %3830 = vmatprep.mubr.msk.bf16.mxu1 %vm4172_vm1, %v4171_v24 }
 0x6ef   : > { %v1529_v54 = vpop.f32.mrb[32].mxu0 }
 0x6f0   : > { %v3772_v55 = vpop.f32.mrb[33].mxu0 }
 0x6f1   : > { %v1532_v56 = vpop.f32.mrb[34].mxu0  ;;  %v1575_v58 = vpop.f32.mrb[40].mxu1 }
 0x6f2   : > { %v1673_v59 = vpack.c.bf16 %v1575_v58, %v1529_v54  ;;  %v3773_v60 = vpop.f32.mrb[35].mxu0  ;;  %v3778_v62 = vpop.f32.mrb[41].mxu1 }
 0x6f3   : > { %v1578_v63 = vpop.f32.mrb[42].mxu1 }
 0x6f4   : > { %v3779_v0 = vpop.f32.mrb[43].mxu1  ;;  %3794 = vmatprep.mubr.msk.bf16.mxu0 %vm594_vm2, %v1673_v59 }
 0x6f7   : > { %v1621_v1 = vpop.f32.mrb[36].mxu0 }
 0x6f8   : > { %v3784_v2 = vpop.f32.mrb[37].mxu0 }
 0x6f9   : > { %v1624_v3 = vpop.f32.mrb[38].mxu0  ;;  %v1667_v4 = vpop.f32.mrb[44].mxu1 }
 0x6fa   : > { %v1674_v5 = vpack.c.bf16 %v1667_v4, %v1621_v1  ;;  %v3785_v61 = vpop.f32.mrb[39].mxu0  ;;  %v3790_v7 = vpop.f32.mrb[45].mxu1 }
 0x6fb   : > { %v1670_v11 = vpop.f32.mrb[46].mxu1 }
 0x6fc   : > { %v3791_v57 = vpop.f32.mrb[47].mxu1  ;;  %3795 = vmatmul.mubr.msk.bf16.vlgmr.msra.gmra.mrb[40].mxu0 %vm594_vm2, %v1674_v5 }
 0x6fd   : > { %3800 = vmatprep.mubr.msk.bf16.mxu0 %vm594_vm2, %v1016_v29  ;;  %3799 = vmatpush3.bf16.msra.mxu0 %v1742_v8 }
 0x6fe   : > { %3820 = vmatprep.subr.bf16.mxu0 %v4035_v9 }
 0x701   : > { %v3810_v14 = vpop.f32.mrb[48].mxu1 }
 0x702   : > { %v1862_v16 = vpop.f32.mrb[49].mxu1  ;;  %v1871_v13 = vadd.f32 %v3810_v14, %v3448_v33 }
 0x703   : > { %v3811_v17 = vpop.f32.mrb[50].mxu1  ;;  %v1863_v32 = vadd.f32 %v3448_v33, %v1862_v16 }
 0x704   : > { %v1865_v19 = vpop.f32.mrb[51].mxu1  ;;  %v2017_v44 = vpack.c.bf16 %v1871_v13, %v1871_v13  ;;  %v1874_v46 = vadd.f32 %v3811_v17, %v3448_v33 }
 0x705   : > { %v2015_v36 = vpack.c.bf16 %v1863_v32, %v1863_v32  ;;  %v1866_v41 = vadd.f32 %v3448_v33, %v1865_v19 }
 0x706   : > { %v2018_v47 = vpack.c.bf16 %v1874_v46, %v1874_v46 }
 0x707   : > { %v2016_v43 = vpack.c.bf16 %v1866_v41, %v1866_v41 }
 0x708   : > { %3801 = vmatmul.mubr.msk.bf16.vlgmr.msra.gmra.mrb[40].mxu0 %vm594_vm2, %v1017_v38 }
 0x709   : > { %3821 = vmatpush3.bf16.msra.mxu0 %v4035_v9  ;;  %v3818_v28 = vpop.f32.mrb[52].mxu1  ;;  %3824 = vmatprep.mubr.msk.bf16.mxu0 %vm376_vm0, %v4313_v20 }
 0x70a   : > { %v1931_v29 = vpop.f32.mrb[53].mxu1  ;;  %3822 = vmatprep.subr.bf16.mxu0 %v4036_v21  ;;  %v1940_v37 = vadd.f32 %v3818_v28, %v3454_v22 }
 0x70b   : > { %v1932_v25 = vadd.f32 %v3454_v22, %v1931_v29  ;;  %v3819_v26 = vpop.f32.mrb[54].mxu1 }
 0x70c   : > { %v1934_v27 = vpop.f32.mrb[55].mxu1  ;;  %v2021_v35 = vpack.c.bf16 %v1940_v37, %v1940_v37  ;;  %v1943_v39 = vadd.f32 %v3819_v26, %v3454_v22 }
 0x70d   : > { %v2019_v30 = vpack.c.bf16 %v1932_v25, %v1932_v25  ;;  %v1935_v31 = vadd.f32 %v3454_v22, %v1934_v27  ;;  %3823 = vmatpush3.bf16.msra.mxu0 %v4036_v21 }
 0x70e   : > { %3834 = vmatprep.subr.bf16.mxu0 %v4171_v24  ;;  %v2123_v42 = vsel %vm594_vm2, %v2021_v35, 0  ;;  %v2022_v18 = vpack.c.bf16 %v1943_v39, %v1943_v39 }
 0x70f   : > { %v2031_v38 = vsel %vm594_vm2, %v2019_v30, 0  ;;  %v2020_v34 = vpack.c.bf16 %v1935_v31, %v1935_v31 }
 0x710   : > { %3829 = vmatpush3.bf16.xpose.msra.mxu1 %v2031_v38  ;;  %3825 = vmatmul.mubr.msk.bf16.vlgmr.msra.gmra.mrb[44].mxu0 %vm376_vm0, %v4315_v23  ;;  %v2169_v45 = vsel %vm594_vm2, %v2022_v18, 0 }
 0x711   : > { %3840 = vmatprep.subr.bf16.mxu1 %v4171_v24  ;;  %3836 = vmatprep.mubr.msk.bf16.mxu0 %vm4172_vm1, %v4171_v24  ;;  %v2077_v40 = vsel %vm594_vm2, %v2020_v34, 0 }
 0x716   : > { %3835 = vmatpush3.bf16.xpose.msra.mxu0 %v2077_v40 }
 0x717   : > { %3831 = vmatmul.mubr.msk.bf16.vlgmr.msra.gmra.mrb[56].mxu1 %vm594_vm2, %v2015_v36  ;;  %3846 = vmatprep.subr.bf16.mxu0 %v4171_v24 }
 0x718   : > { %3841 = vmatpush3.bf16.xpose.msra.mxu1 %v2123_v42  ;;  %3842 = vmatprep.mubr.msk.bf16.mxu1 %vm4172_vm1, %v4171_v24 }
 0x719   : > { %3852 = vmatprep.subr.bf16.mxu1 %v4171_v24 }
 0x71d   : > { %3837 = vmatmul.mubr.msk.bf16.vlgmr.msra.gmra.mrb[48].mxu0 %vm594_vm2, %v2016_v43 }
 0x71e   : > { %3847 = vmatpush3.bf16.xpose.msra.mxu0 %v2169_v45  ;;  %3848 = vmatprep.mubr.msk.bf16.mxu0 %vm4172_vm1, %v4171_v24 }
 0x71f   : > { %3843 = vmatmul.mubr.msk.bf16.vlgmr.msra.gmra.mrb[60].mxu1 %vm594_vm2, %v2017_v44  ;;  %3858 = vmatprep.subr.bf16.mxu0 %v4171_v24 }
 0x720   : > { %3854 = vmatprep.mubr.msk.bf16.mxu1 %vm4172_vm1, %v4171_v24 }
 0x725   : > { %3849 = vmatmul.mubr.msk.bf16.vlgmr.msra.gmra.mrb[52].mxu0 %vm594_vm2, %v2018_v47 }
 0x726   : > { %3860 = vmatprep.mubr.msk.bf16.mxu0 %vm4172_vm1, %v4171_v24 }
 0x7e3   : > { %v3826_v49 = vpop.f32.mrb[44].mxu0 }
 0x7e4   : > { %v4578_v50 = vadd.f32 %v3826_v49, %v3460_v48  ;;  %v2000_v51 = vpop.f32.mrb[45].mxu0 }
 0x7e5   : > { %v2001_v52 = vadd.f32 %v3460_v48, %v2000_v51  ;;  %v3827_v53 = vpop.f32.mrb[46].mxu0 }
 0x7e6   : > { %v4580_v54 = vadd.f32 %v3827_v53, %v3460_v48  ;;  %v2003_v55 = vpop.f32.mrb[47].mxu0  ;;  %v2025_v53 = vpack.c.bf16 %v4578_v50, %v4578_v50 }
 0x7e7   : > { %v2023_v56 = vpack.c.bf16 %v2001_v52, %v2001_v52  ;;  %v2004_v58 = vadd.f32 %v3460_v48, %v2003_v55 }
 0x7e8   : > { %v2026_v50 = vpack.c.bf16 %v4580_v54, %v4580_v54 }
 0x7e9   : > { %v2267_v59 = vsel %vm834_vm3, %v2023_v56, 0  ;;  %v2024_v60 = vpack.c.bf16 %v2004_v58, %v2004_v58 }
 0x7ea   : > { %v2067_v62 = vpop.f32.mrb[56].mxu1  ;;  %3853 = vmatpush3.bf16.msra.mxu1 %v2267_v59  ;;  %v4037_v59 = vld [vmem:[%s4777_s3 + $0x30] sm:$0xff]  }
 0x7eb   : > { %v2211_v63 = vmul.f32 0.35355338, %v2067_v62  ;;  %v2313_v0 = vsel %vm834_vm3, %v2024_v60, 0  ;;  %v3832_v1 = vpop.f32.mrb[57].mxu1  ;;  %3864 = vmatprep.subr.bf16.mxu1 %v4171_v24  ;;  %v2359_v60 = vsel %vm834_vm3, %v2025_v53, 0 }
 0x7ec   : > { %v2070_v2 = vpop.f32.mrb[58].mxu1  ;;  %3859 = vmatpush3.bf16.msra.mxu0 %v2313_v0 }
 0x7ed   : > { %v3833_v3 = vpop.f32.mrb[59].mxu1  ;;  %v2215_v4 = vsel %vm594_vm2, %v2211_v63, -inf  ;;  %3870 = vmatprep.subr.bf16.mxu0 %v4171_v24 }
 0x7ee   : > { %2216 = vmax.xlane.f32.xlu0 %v2215_v4  ;;  %v2405_v3 = vsel %vm834_vm3, %v2026_v50, 0 }
 0x7f0   : > { %v2113_v5 = vpop.f32.mrb[48].mxu0 }
 0x7f1   : > { %v2212_v61 = vmul.f32 0.35355338, %v2113_v5  ;;  %v3838_v7 = vpop.f32.mrb[49].mxu0  ;;  %v4038_v5 = vld [vmem:[%s4777_s3 + $0x38] sm:$0xff]  }
 0x7f2   : > { %v2116_v8 = vpop.f32.mrb[50].mxu0  ;;  %v2159_v9 = vpop.f32.mrb[60].mxu1  ;;  %v4039_v7 = vld [vmem:[%s4777_s3 + $0x70] sm:$0xff]  }
 0x7f3   : > { %v3839_v11 = vpop.f32.mrb[51].mxu0  ;;  %v2213_v57 = vmul.f32 0.35355338, %v2159_v9  ;;  %v3844_v14 = vpop.f32.mrb[61].mxu1  ;;  %v2218_v16 = vsel %vm594_vm2, %v2212_v61, -inf  ;;  %v4040_v9 = vld [vmem:[%s4777_s3 + $0x78] sm:$0xff]  }
 0x7f4   : > { %2219 = vmax.xlane.f32.xlu0 %v2218_v16  ;;  %v2162_v17 = vpop.f32.mrb[62].mxu1 }
 0x7f5   : > { %v3845_v19 = vpop.f32.mrb[63].mxu1  ;;  %v2221_v21 = vsel %vm594_vm2, %v2213_v57, -inf }
 0x7f6   : > { %2222 = vmax.xlane.f32.xlu1 %v2221_v21 }
 0x7f8   : > { %v2205_v22 = vpop.f32.mrb[52].mxu0 }
 0x7f9   : > { %v2214_v28 = vmul.f32 0.35355338, %v2205_v22  ;;  %v3850_v29 = vpop.f32.mrb[53].mxu0 }
 0x7fa   : > { %v2208_v25 = vpop.f32.mrb[54].mxu0 }
 0x7fb   : > { %v3851_v26 = vpop.f32.mrb[55].mxu0  ;;  %v2224_v27 = vsel %vm594_vm2, %v2214_v28, -inf }
 0x7fc   : > { %2225 = vmax.xlane.f32.xlu1 %v2224_v27 }
 0x87b   : > { %v2217_v30 = vpop.xlane.xlu0 %2216 }
 0x87c   : > { %v2227_v31 = vsub.f32 %v2211_v63, %v2217_v30 }
 0x87e   : > { %v2231_v33 = vmul.f32 1.442695, %v2227_v31 }
 0x880   : > { %4075 = vpow2.f32 %v2231_v33  ;;  %v4042_v33 = vld [vmem:[%s4777_s3 + $0xb8] sm:$0xff]  }
 0x881   : > { %v2220_v37 = vpop.xlane.xlu0 %2219 }
 0x882   : > { %v2228_v38 = vsub.f32 %v2212_v61, %v2220_v37 }
 0x883   : > { %v2223_v32 = vpop.xlane.xlu1 %2222 }
 0x884   : > { %v2233_v34 = vmul.f32 1.442695, %v2228_v38  ;;  %v2229_v35 = vsub.f32 %v2213_v57, %v2223_v32 }
 0x886   : > { %4077 = vpow2.f32 %v2233_v34  ;;  %v2235_v36 = vmul.f32 1.442695, %v2229_v35 }
 0x888   : > { %4079 = vpow2.f32 %v2235_v36 }
 0x889   : > { %v2226_v39 = vpop.xlane.xlu1 %2225 }
 0x88a   : > { %v4076_v40 = vpop.eup %4075  ;;  %v2230_v41 = vsub.f32 %v2214_v28, %v2226_v39  ;;  %v3495_v39 = vld [vmem:[%s4778_s4 + $0x7] ss:$0 sm:$0xff] }
 0x88b   : > { %v2239_v42 = vsel %vm594_vm2, %v4076_v40, 0.0 }
 0x88c   : > { %v2237_v13 = vmul.f32 1.442695, %v2230_v41  ;;  %2240 = vadd.xlane.f32.xlu0 %v2239_v42 }
 0x88e   : > { %4081 = vpow2.f32 %v2237_v13 }
 0x890   : > { %v4078_v18 = vpop.eup %4077 }
 0x891   : > { %v2242_v43 = vsel %vm594_vm2, %v4078_v18, 0.0 }
 0x892   : > { %v4080_v44 = vpop.eup %4079  ;;  %2243 = vadd.xlane.f32.xlu0 %v2242_v43 }
 0x893   : > { %v2245_v45 = vsel %vm594_vm2, %v4080_v44, 0.0 }
 0x894   : > { %2246 = vadd.xlane.f32.xlu1 %v2245_v45 }
 0x898   : > { %v4082_v46 = vpop.eup %4081 }
 0x899   : > { %v2248_v47 = vsel %vm594_vm2, %v4082_v46, 0.0 }
 0x89a   : > { %2249 = vadd.xlane.f32.xlu1 %v2248_v47 }
 0x919   : > { %v2241_v48 = vpop.xlane.xlu0 %2240 }
 0x91a   : > { %4083 = vrcp.f32 %v2241_v48 }
 0x91f   : > { %v2244_v49 = vpop.xlane.xlu0 %2243 }
 0x920   : > { %4085 = vrcp.f32 %v2244_v49 }
 0x921   : > { %v2247_v51 = vpop.xlane.xlu1 %2246 }
 0x922   : > { %4087 = vrcp.f32 %v2247_v51 }
 0x924   : > { %v4084_v52 = vpop.eup %4083 }
 0x925   : > { %v2255_v55 = vmul.f32 %v4084_v52, %v4076_v40 }
 0x927   : > { %v2250_v56 = vpop.xlane.xlu1 %2249  ;;  %v2259_v58 = vpack.c.bf16 %v2255_v55, %v2255_v55 }
 0x928   : > { %4089 = vrcp.f32 %v2250_v56 }
 0x929   : > { %3855 = vmatmul.mubr.msk.bf16.vlgmr.msra.gmra.mrb[64].mxu1 %vm594_vm2, %v2259_v58 }
 0x92a   : > { %v4086_v62 = vpop.eup %4085  ;;  %3865 = vmatpush3.bf16.msra.mxu1 %v2359_v60  ;;  %3866 = vmatprep.mubr.msk.bf16.mxu1 %vm4172_vm1, %v4171_v24 }
 0x92b   : > { %v2256_v63 = vmul.f32 %v4086_v62, %v4078_v18  ;;  %3882 = vmatprep.subr.bf16.mxu1 %v4037_v59 }
 0x92c   : > { %v4088_v0 = vpop.eup %4087 }
 0x92d   : > { %v2257_v1 = vmul.f32 %v4088_v0, %v4080_v44  ;;  %v2260_v2 = vpack.c.bf16 %v2256_v63, %v2256_v63  ;;  %v3489_v44 = vld [vmem:[%s4778_s4 + $0x3] ss:$0 sm:$0xff]  ;;  %v3501_v0 = vld [vmem:[%s4778_s4 + $0xb] ss:$0 sm:$0xff] }
 0x92f   : > { %3861 = vmatmul.mubr.msk.bf16.vlgmr.msra.gmra.mrb[56].mxu0 %vm594_vm2, %v2260_v2  ;;  %v2261_v4 = vpack.c.bf16 %v2257_v1, %v2257_v1 }
 0x930   : > { %3871 = vmatpush3.bf16.msra.mxu0 %v2405_v3  ;;  %3872 = vmatprep.mubr.msk.bf16.mxu0 %vm4172_vm1, %v4171_v24 }
 0x931   : > { %3867 = vmatmul.mubr.msk.bf16.vlgmr.msra.gmra.mrb[68].mxu1 %vm594_vm2, %v2261_v4 }
 0x932   : > { %v4090_v54 = vpop.eup %4089  ;;  %3883 = vmatpush3.bf16.msra.mxu1 %v4037_v59  ;;  %3886 = vmatprep.mubr.msk.bf16.mxu1 %vm376_vm0, %v4284_v6  ;;  %v3473_v6 = vld [vmem:[%s4779_s5 + $0x8] sm:$0xf] }
 0x933   : > { %v2258_v61 = vmul.f32 %v4090_v54, %v4082_v46  ;;  %3884 = vmatprep.subr.bf16.mxu1 %v4038_v5  ;;  %3974 = vmatprep.subr.msk.bf16.mxu0 %vm834_vm3, %v3473_v6 }
 0x935   : > { %v2262_v8 = vpack.c.bf16 %v2258_v61, %v2258_v61 }
 0x936   : > { %3885 = vmatpush3.bf16.msra.mxu1 %v4038_v5 }
 0x937   : > { %3873 = vmatmul.mubr.msk.bf16.vlgmr.msra.gmra.mrb[60].mxu0 %vm594_vm2, %v2262_v8  ;;  %3890 = vmatprep.subr.bf16.mxu1 %v4039_v7 }
 0x939   : > { %3887 = vmatmul.mubr.msk.bf16.vlgmr.msra.gmra.mrb[72].mxu1 %vm376_vm0, %v4286_v10  ;;  %v2458_v10 = vsel %vm834_vm3, %v3473_v6, 0 }
 0x93a   : > { %3891 = vmatpush3.bf16.msra.mxu1 %v4039_v7  ;;  %3894 = vmatprep.mubr.msk.bf16.mxu1 %vm376_vm0, %v4291_v12  ;;  %v4041_v12 = vld [vmem:[%s4777_s3 + $0xb0] sm:$0xff]  }
 0x93b   : > { %3892 = vmatprep.subr.bf16.mxu1 %v4040_v9  ;;  %3877 = vmatpush3.bf16.msra.mxu0 %v2458_v10 }
 0x93c   : > { %3898 = vmatprep.subr.bf16.mxu0 %v4041_v12 }
 0x93e   : > { %3893 = vmatpush3.bf16.msra.mxu1 %v4040_v9 }
 0x93f   : > { %3906 = vmatprep.subr.bf16.mxu1 %v4171_v24 }
 0x941   : > { %3895 = vmatmul.mubr.msk.bf16.vlgmr.msra.gmra.mrb[76].mxu1 %vm376_vm0, %v4299_v15 }
 0x942   : > { %3908 = vmatprep.mubr.msk.bf16.mxu1 %vm4172_vm1, %v4171_v24 }
 0x9fc   : > { %v2303_v11 = vpop.f32.mrb[64].mxu1 }
 0x9fd   : > { %v3856_v57 = vpop.f32.mrb[65].mxu1 }
 0x9fe   : > { %v2306_v15 = vpop.f32.mrb[66].mxu1 }
 0x9ff   : > { %v3857_v14 = vpop.f32.mrb[67].mxu1 }
 0xa02   : > { %v2349_v16 = vpop.f32.mrb[56].mxu0 }
 0xa03   : > { %v2447_v17 = vpack.c.bf16 %v2349_v16, %v2303_v11  ;;  %v3862_v19 = vpop.f32.mrb[57].mxu0 }
 0xa04   : > { %v2352_v21 = vpop.f32.mrb[58].mxu0  ;;  %v2395_v22 = vpop.f32.mrb[68].mxu1 }
 0xa05   : > { %v3863_v28 = vpop.f32.mrb[59].mxu0  ;;  %3878 = vmatprep.mubr.msk.bf16.mxu0 %vm594_vm2, %v2447_v17  ;;  %v3868_v29 = vpop.f32.mrb[69].mxu1 }
 0xa06   : > { %v2398_v25 = vpop.f32.mrb[70].mxu1 }
 0xa07   : > { %v3869_v26 = vpop.f32.mrb[71].mxu1 }
 0xa0a   : > { %v2441_v27 = vpop.f32.mrb[60].mxu0 }
 0xa0b   : > { %v2448_v30 = vpack.c.bf16 %v2441_v27, %v2395_v22  ;;  %v3874_v31 = vpop.f32.mrb[61].mxu0 }
 0xa0c   : > { %v2444_v37 = vpop.f32.mrb[62].mxu0  ;;  %v3888_v38 = vpop.f32.mrb[72].mxu1 }
 0xa0d   : > { %v3875_v32 = vpop.f32.mrb[63].mxu0  ;;  %3879 = vmatmul.mubr.msk.bf16.vlgmr.msra.gmra.mrb[40].mxu0 %vm594_vm2, %v2448_v30  ;;  %v2582_v34 = vpop.f32.mrb[73].mxu1  ;;  %v2591_v59 = vadd.f32 %v3888_v38, %v3489_v44 }
 0xa0e   : > { %v3889_v35 = vpop.f32.mrb[74].mxu1  ;;  %3899 = vmatpush3.bf16.msra.mxu0 %v4041_v12  ;;  %3902 = vmatprep.mubr.msk.bf16.mxu0 %vm376_vm0, %v4313_v20  ;;  %v2583_v48 = vadd.f32 %v3489_v44, %v2582_v34 }
 0xa0f   : > { %v2585_v36 = vpop.f32.mrb[75].mxu1  ;;  %3900 = vmatprep.subr.bf16.mxu0 %v4042_v33  ;;  %v2594_v62 = vadd.f32 %v3889_v35, %v3489_v44  ;;  %v2737_v50 = vpack.c.bf16 %v2591_v59, %v2591_v59 }
 0xa10   : > { %v2586_v51 = vadd.f32 %v3489_v44, %v2585_v36  ;;  %v2735_v53 = vpack.c.bf16 %v2583_v48, %v2583_v48 }
 0xa11   : > { %v2738_v63 = vpack.c.bf16 %v2594_v62, %v2594_v62 }
 0xa12   : > { %3901 = vmatpush3.bf16.msra.mxu0 %v4042_v33  ;;  %v2736_v56 = vpack.c.bf16 %v2586_v51, %v2586_v51 }
 0xa13   : > { %3912 = vmatprep.subr.bf16.mxu0 %v4171_v24 }
 0xa14   : > { %v3896_v40 = vpop.f32.mrb[76].mxu1 }
 0xa15   : > { %v2651_v41 = vpop.f32.mrb[77].mxu1  ;;  %3903 = vmatmul.mubr.msk.bf16.vlgmr.msra.gmra.mrb[64].mxu0 %vm376_vm0, %v4315_v23  ;;  %v2660_v45 = vadd.f32 %v3896_v40, %v3495_v39 }
 0xa16   : > { %v2652_v42 = vadd.f32 %v3495_v39, %v2651_v41  ;;  %v3897_v13 = vpop.f32.mrb[78].mxu1  ;;  %3914 = vmatprep.mubr.msk.bf16.mxu0 %vm4172_vm1, %v4171_v24 }
 0xa17   : > { %v2654_v20 = vpop.f32.mrb[79].mxu1  ;;  %v2663_v49 = vadd.f32 %v3897_v13, %v3495_v39  ;;  %v2741_v52 = vpack.c.bf16 %v2660_v45, %v2660_v45 }
 0xa18   : > { %v2739_v18 = vpack.c.bf16 %v2652_v42, %v2652_v42  ;;  %v2655_v43 = vadd.f32 %v3495_v39, %v2654_v20 }
 0xa19   : > { %v2742_v55 = vpack.c.bf16 %v2663_v49, %v2663_v49  ;;  %v2843_v58 = vsel %vm594_vm2, %v2741_v52, 0 }
 0xa1a   : > { %v2751_v46 = vsel %vm594_vm2, %v2739_v18, 0  ;;  %v2740_v47 = vpack.c.bf16 %v2655_v43, %v2655_v43 }
 0xa1b   : > { %3907 = vmatpush3.bf16.xpose.msra.mxu1 %v2751_v46  ;;  %v2889_v60 = vsel %vm594_vm2, %v2742_v55, 0 }
 0xa1c   : > { %v2797_v23 = vsel %vm594_vm2, %v2740_v47, 0  ;;  %3918 = vmatprep.subr.bf16.mxu1 %v4171_v24 }
 0xa1d   : > { %3913 = vmatpush3.bf16.xpose.msra.mxu0 %v2797_v23 }
 0xa1e   : > { %3924 = vmatprep.subr.bf16.mxu0 %v4171_v24 }
 0xa22   : > { %3909 = vmatmul.mubr.msk.bf16.vlgmr.msra.gmra.mrb[80].mxu1 %vm594_vm2, %v2735_v53 }
 0xa23   : > { %3919 = vmatpush3.bf16.xpose.msra.mxu1 %v2843_v58  ;;  %3920 = vmatprep.mubr.msk.bf16.mxu1 %vm4172_vm1, %v4171_v24 }
 0xa24   : > { %3915 = vmatmul.mubr.msk.bf16.vlgmr.msra.gmra.mrb[68].mxu0 %vm594_vm2, %v2736_v56  ;;  %3930 = vmatprep.subr.bf16.mxu1 %v4171_v24 }
 0xa25   : > { %3925 = vmatpush3.bf16.xpose.msra.mxu0 %v2889_v60  ;;  %3926 = vmatprep.mubr.msk.bf16.mxu0 %vm4172_vm1, %v4171_v24 }
 0xa26   : > { %3936 = vmatprep.subr.bf16.mxu0 %v4171_v24 }
 0xa2a   : > { %3921 = vmatmul.mubr.msk.bf16.vlgmr.msra.gmra.mrb[84].mxu1 %vm594_vm2, %v2737_v50 }
 0xa2b   : > { %3932 = vmatprep.mubr.msk.bf16.mxu1 %vm4172_vm1, %v4171_v24 }
 0xa2c   : > { %3927 = vmatmul.mubr.msk.bf16.vlgmr.msra.gmra.mrb[72].mxu0 %vm594_vm2, %v2738_v63 }
 0xa2d   : > { %3938 = vmatprep.mubr.msk.bf16.mxu0 %vm4172_vm1, %v4171_v24 }
 0xae8   : > { %v3904_v1 = vpop.f32.mrb[64].mxu0 }
 0xae9   : > { %v4680_v2 = vadd.f32 %v3904_v1, %v3501_v0  ;;  %v2720_v3 = vpop.f32.mrb[65].mxu0 }
 0xaea   : > { %v2721_v4 = vadd.f32 %v3501_v0, %v2720_v3  ;;  %v3905_v5 = vpop.f32.mrb[66].mxu0 }
 0xaeb   : > { %v4682_v54 = vadd.f32 %v3905_v5, %v3501_v0  ;;  %v2723_v61 = vpop.f32.mrb[67].mxu0  ;;  %v2745_v63 = vpack.c.bf16 %v4680_v2, %v4680_v2 }
 0xaec   : > { %v2743_v7 = vpack.c.bf16 %v2721_v4, %v2721_v4  ;;  %v2724_v8 = vadd.f32 %v3501_v0, %v2723_v61 }
 0xaed   : > { %v2746_v3 = vpack.c.bf16 %v4682_v54, %v4682_v54  ;;  %v3079_v61 = vsel %vm834_vm3, %v2745_v63, 0 }
 0xaee   : > { %v2987_v9 = vsel %vm834_vm3, %v2743_v7, 0  ;;  %v2744_v6 = vpack.c.bf16 %v2724_v8, %v2724_v8 }
 0xaef   : > { %3931 = vmatpush3.bf16.msra.mxu1 %v2987_v9  ;;  %v3125_v8 = vsel %vm834_vm3, %v2746_v3, 0 }
 0xaf0   : > { %v3033_v10 = vsel %vm834_vm3, %v2744_v6, 0  ;;  %3942 = vmatprep.subr.bf16.mxu1 %v4171_v24 }
 0xaf1   : > { %3937 = vmatpush3.bf16.msra.mxu0 %v3033_v10 }
 0xaf2   : > { %3948 = vmatprep.subr.bf16.mxu0 %v4171_v24 }
 0xaf5   : > { %v2787_v12 = vpop.f32.mrb[80].mxu1 }
 0xaf6   : > { %v2931_v11 = vmul.f32 0.35355338, %v2787_v12  ;;  %v3910_v57 = vpop.f32.mrb[81].mxu1 }
 0xaf7   : > { %v2790_v15 = vpop.f32.mrb[82].mxu1  ;;  %v2833_v14 = vpop.f32.mrb[68].mxu0 }
 0xaf8   : > { %v2932_v16 = vmul.f32 0.35355338, %v2833_v14  ;;  %v3911_v17 = vpop.f32.mrb[83].mxu1  ;;  %v3916_v19 = vpop.f32.mrb[69].mxu0  ;;  %v2935_v21 = vsel %vm594_vm2, %v2931_v11, -inf }
 0xaf9   : > { %v2836_v22 = vpop.f32.mrb[70].mxu0  ;;  %2936 = vmax.xlane.f32.xlu0 %v2935_v21 }
 0xafa   : > { %v3917_v28 = vpop.f32.mrb[71].mxu0  ;;  %v2938_v29 = vsel %vm594_vm2, %v2932_v16, -inf }
 0xafb   : > { %2939 = vmax.xlane.f32.xlu1 %v2938_v29 }
 0xafd   : > { %v2879_v25 = vpop.f32.mrb[84].mxu1 }
 0xafe   : > { %v2933_v26 = vmul.f32 0.35355338, %v2879_v25  ;;  %v3922_v27 = vpop.f32.mrb[85].mxu1 }
 0xaff   : > { %v2882_v30 = vpop.f32.mrb[86].mxu1  ;;  %v2925_v31 = vpop.f32.mrb[72].mxu0 }
 0xb00   : > { %v2934_v33 = vmul.f32 0.35355338, %v2925_v31  ;;  %v3923_v37 = vpop.f32.mrb[87].mxu1  ;;  %v3928_v38 = vpop.f32.mrb[73].mxu0  ;;  %v2941_v32 = vsel %vm594_vm2, %v2933_v26, -inf }
 0xb01   : > { %v2928_v34 = vpop.f32.mrb[74].mxu0  ;;  %2942 = vmax.xlane.f32.xlu0 %v2941_v32  ;;  %v3517_v32 = vld [vmem:[%s4780_s6] ss:$0 sm:$0xff] }
 0xb02   : > { %v3929_v35 = vpop.f32.mrb[75].mxu0  ;;  %v2944_v36 = vsel %vm594_vm2, %v2934_v33, -inf }
 0xb03   : > { %2945 = vmax.xlane.f32.xlu1 %v2944_v36 }
 0xb86   : > { %v2937_v39 = vpop.xlane.xlu0 %2936 }
 0xb87   : > { %v2947_v40 = vsub.f32 %v2931_v11, %v2937_v39  ;;  %v3514_v11 = vld [vmem:[%s4779_s5 + $0xc] sm:$0xf] }
 0xb88   : > { %v2940_v41 = vpop.xlane.xlu1 %2939  ;;  %v3178_v57 = vsel %vm834_vm3, %v3514_v11, 0 }
 0xb89   : > { %v2951_v42 = vmul.f32 1.442695, %v2947_v40  ;;  %v2948_v13 = vsub.f32 %v2932_v16, %v2940_v41 }
 0xb8b   : > { %4091 = vpow2.f32 %v2951_v42  ;;  %v2953_v20 = vmul.f32 1.442695, %v2948_v13 }
 0xb8d   : > { %4093 = vpow2.f32 %v2953_v20 }
 0xb8e   : > { %v2943_v18 = vpop.xlane.xlu0 %2942 }
 0xb8f   : > { %v2949_v43 = vsub.f32 %v2933_v26, %v2943_v18 }
 0xb90   : > { %v2946_v44 = vpop.xlane.xlu1 %2945 }
 0xb91   : > { %v2955_v45 = vmul.f32 1.442695, %v2949_v43  ;;  %v2950_v46 = vsub.f32 %v2934_v33, %v2946_v44 }
 0xb93   : > { %4095 = vpow2.f32 %v2955_v45  ;;  %v2957_v47 = vmul.f32 1.442695, %v2950_v46 }
 0xb95   : > { %v4092_v48 = vpop.eup %4091  ;;  %4097 = vpow2.f32 %v2957_v47 }
 0xb96   : > { %v2959_v49 = vsel %vm594_vm2, %v4092_v48, 0.0 }
 0xb97   : > { %v4094_v23 = vpop.eup %4093  ;;  %2960 = vadd.xlane.f32.xlu0 %v2959_v49 }
 0xb98   : > { %v2962_v51 = vsel %vm594_vm2, %v4094_v23, 0.0 }
 0xb99   : > { %2963 = vadd.xlane.f32.xlu1 %v2962_v51 }
 0xb9d   : > { %v4096_v52 = vpop.eup %4095 }
 0xb9e   : > { %v2965_v53 = vsel %vm594_vm2, %v4096_v52, 0.0 }
 0xb9f   : > { %v4098_v55 = vpop.eup %4097  ;;  %2966 = vadd.xlane.f32.xlu0 %v2965_v53 }
 0xba0   : > { %v2968_v56 = vsel %vm594_vm2, %v4098_v55, 0.0 }
 0xba1   : > { %2969 = vadd.xlane.f32.xlu1 %v2968_v56 }
 0xc24   : > { %v2961_v58 = vpop.xlane.xlu0 %2960 }
 0xc25   : > { %4099 = vrcp.f32 %v2961_v58 }
 0xc26   : > { %v2964_v59 = vpop.xlane.xlu1 %2963 }
 0xc27   : > { %4101 = vrcp.f32 %v2964_v59 }
 0xc2c   : > { %v2967_v60 = vpop.xlane.xlu0 %2966 }
 0xc2d   : > { %4103 = vrcp.f32 %v2967_v60 }
 0xc2e   : > { %v2970_v62 = vpop.xlane.xlu1 %2969 }
 0xc2f   : > { %v4100_v50 = vpop.eup %4099  ;;  %4105 = vrcp.f32 %v2970_v62 }
 0xc30   : > { %v2975_v0 = vmul.f32 %v4100_v50, %v4092_v48 }
 0xc31   : > { %v4102_v1 = vpop.eup %4101 }
 0xc32   : > { %v2976_v4 = vmul.f32 %v4102_v1, %v4094_v23  ;;  %v2979_v5 = vpack.c.bf16 %v2975_v0, %v2975_v0 }
 0xc34   : > { %3933 = vmatmul.mubr.msk.bf16.vlgmr.msra.gmra.mrb[88].mxu1 %vm594_vm2, %v2979_v5  ;;  %v2980_v7 = vpack.c.bf16 %v2976_v4, %v2976_v4 }
 0xc35   : > { %3943 = vmatpush3.bf16.msra.mxu1 %v3079_v61  ;;  %3944 = vmatprep.mubr.msk.bf16.mxu1 %vm4172_vm1, %v4171_v24 }
 0xc36   : > { %3939 = vmatmul.mubr.msk.bf16.vlgmr.msra.gmra.mrb[76].mxu0 %vm594_vm2, %v2980_v7 }
 0xc37   : > { %v4104_v2 = vpop.eup %4103  ;;  %3949 = vmatpush3.bf16.msra.mxu0 %v3125_v8  ;;  %3950 = vmatprep.mubr.msk.bf16.mxu0 %vm4172_vm1, %v4171_v24 }
 0xc38   : > { %v2977_v54 = vmul.f32 %v4104_v2, %v4096_v52  ;;  %3975 = vmatprep.subr.msk.bf16.mxu0 %vm834_vm3, %v3514_v11 }
 0xc39   : > { %v4106_v9 = vpop.eup %4105 }
 0xc3a   : > { %v2981_v6 = vpack.c.bf16 %v2977_v54, %v2977_v54  ;;  %v2978_v10 = vmul.f32 %v4106_v9, %v4098_v55 }
 0xc3c   : > { %v2982_v12 = vpack.c.bf16 %v2978_v10, %v2978_v10  ;;  %3945 = vmatmul.mubr.msk.bf16.vlgmr.msra.gmra.mrb[92].mxu1 %vm594_vm2, %v2981_v6 }
 0xc3e   : > { %3951 = vmatmul.mubr.msk.bf16.vlgmr.msra.gmra.mrb[80].mxu0 %vm594_vm2, %v2982_v12 }
 0xc3f   : > { %3955 = vmatpush3.bf16.msra.mxu0 %v3178_v57 }
 0xd07   : > { %v3023_v15 = vpop.f32.mrb[88].mxu1 }
 0xd08   : > { %v3934_v24 = vpop.f32.mrb[89].mxu1 }
 0xd09   : > { %v3026_v14 = vpop.f32.mrb[90].mxu1  ;;  %v3069_v16 = vpop.f32.mrb[76].mxu0 }
 0xd0a   : > { %v3167_v17 = vpack.c.bf16 %v3069_v16, %v3023_v15  ;;  %v3935_v19 = vpop.f32.mrb[91].mxu1  ;;  %v3940_v21 = vpop.f32.mrb[77].mxu0 }
 0xd0b   : > { %v3072_v22 = vpop.f32.mrb[78].mxu0 }
 0xd0c   : > { %v3941_v28 = vpop.f32.mrb[79].mxu0  ;;  %3956 = vmatprep.mubr.msk.bf16.mxu0 %vm594_vm2, %v3167_v17 }
 0xd0f   : > { %v3115_v29 = vpop.f32.mrb[92].mxu1 }
 0xd10   : > { %v3946_v25 = vpop.f32.mrb[93].mxu1 }
 0xd11   : > { %v3118_v26 = vpop.f32.mrb[94].mxu1  ;;  %v3161_v27 = vpop.f32.mrb[80].mxu0 }
 0xd12   : > { %v3168_v30 = vpack.c.bf16 %v3161_v27, %v3115_v29  ;;  %v3947_v31 = vpop.f32.mrb[95].mxu1  ;;  %v3952_v33 = vpop.f32.mrb[81].mxu0 }
 0xd13   : > { %v3164_v37 = vpop.f32.mrb[82].mxu0 }
 0xd14   : > { %v3953_v38 = vpop.f32.mrb[83].mxu0  ;;  %3957 = vmatmul.mubr.msk.bf16.vlgmr.msra.gmra.mrb[40].mxu0 %vm594_vm2, %v3168_v30 }
 0xde7   : > { %v3958_v34 = vpop.f32.mrb[40].mxu0 }
 0xde8   : > { %v3242_v35 = vadd.f32 %v3958_v34, %v3517_v32  ;;  %v3214_v36 = vpop.f32.mrb[41].mxu0 }
 0xde9   : > { %v3240_v39 = vadd.f32 %v3517_v32, %v3214_v36  ;;  %v3959_v40 = vpop.f32.mrb[42].mxu0 }
 0xdea   : > { %3246 = vst.msk [vmem:[%s304_s29 + $0x10] sm:$0xff] %vm376_vm0, %v3242_v35  ;;  %v3243_v41 = vadd.f32 %v3959_v40, %v3517_v32  ;;  %v3217_v42 = vpop.f32.mrb[43].mxu0 }
 0xdeb   : > { %3244 = vst.msk [vmem:[%s304_s29] sm:$0xff] %vm376_vm0, %v3240_v39  ;;  %v3241_v13 = vadd.f32 %v3517_v32, %v3217_v42 }
 0xdec   : > { %3247 = vst.msk [vmem:[%s304_s29 + $0x18] sm:$0xff] %vm376_vm0, %v3243_v41 }
 0xded   : > { %3245 = vst.msk [vmem:[%s304_s29 + $0x8] sm:$0xff] %vm376_vm0, %v3241_v13 }
 0xdee   : > { %4120 = shalt.err (!%p4117_p3)
}
 0xdef   : > { %s4121_s21 = scalar_lea.hbm %s4729_s15, 512  ;;  %s4125_s23 = scalar_lea.hbm %s4781_s7, 1024 }
 0xdf0   : > { %p4122_p4 = scmp.ne.s32.totalorder %s4729_s15, %s4121_s21  ;;  %p4126_p9 = scmp.lt.u32.totalorder %s4729_s15, %s4781_s7 }
 0xdf1   : > { %p4127_p10 = scmp.lt.u32.totalorder %s4125_s23, %s4121_s21  ;;  %p4129_p12 = scmp.lt.u32.totalorder %s4121_s21, %s4729_s15 }
 0xdf2   : > { %p4123_p7 = pnand %p4122_p4, %p4254_p5 }
 0xdf3   : > { %p4128_p11 = por %p4127_p10, %p4126_p9 }
 0xdf4   : > { %p4124_p8 = pneg %p4123_p7 }
 0xdf5   : > { %p4130_p13 = por %p4129_p12, %p4128_p11 }
 0xdf7   : > { %p4131_p0 = pnand %p4130_p13, %p4124_p8 }
 0xdf9   : > { %4134 = shalt.err (!%p4131_p0)
}
 0xdfa   : > { %s4174_s13 = smov 128   ;;  %s4175_s14 = smov 8  }
 0xdfb   : > { %3976 = dma.vmem_to_hbm [thread:$0]  (%p4254_p5), %s4723_s8, 512, %s4729_s15, %s4733_s28, %s4174_s13, %s4174_s13, %s4175_s14  }
 0xdfc PF: > { %p3982_p1 = scmp.ge.s32.totalorder %s4169_s27, 2  ;;  %s3277_s16 = sand.u32 1, %s4157_s24  }
 0xdfd   : > { %s3278_s17 = scalar_lea.sflag [#allocation3], %s3277_s16 }
 0xdfe   : > { %p3979_p2 = pnand %p3982_p1, %p4258_p6 }
 0xe00   : > { %4152 = dma.done.wait (!%p3979_p2), %s3278_s17, 512  }
 0xe01   : > { %4154 = vsyncadd (!%p3979_p2), %s3278_s17, 4294966784  ;;  %p17_p3 = scmp.ge.s32.totalorder %s4241_s30, 4   ;;  %s4784_s24 = smov %s4161_s25 }
 0xe02   : > { %s4785_s25 = smov %s4165_s26  ;;  %s4786_s26 = smov %s4252_s10 }
 0xe03   : > { %s4787_s27 = smov %s4241_s30  ;;  %19 = sbr.rel (!%p17_p3) target bundleno = 3 (0x3), region = 114 }
 0xe0a   :  { %3283 = vsyncpa [#allocation3], 1 }
 0xe0b   :  { %3285 = vsyncpa [#allocation3 + $0x1], 1 }

</bundles_post_ra>
